<compile_context>
chip_gen: v5e
topology: v5e:2x2
jax: 0.10.0
libtpu: 0.0.40
codegen_flags: <defaults>
</compile_context>

<pallas_src>
import functools

import jax
import jax.numpy as jnp
from jax import lax
from jax.experimental import pallas as pl
from jax.experimental.pallas import tpu as pltpu

HIDDEN = 128


def _sigmoid(z):
    # sigmoid(z) = 0.5 * tanh(0.5 * z) + 0.5  (one EUP op + mul-add; no divide)
    return 0.5 * jnp.tanh(0.5 * z) + 0.5


def mlp_kernel(x_ref, w1_ref, b1_ref, w2_ref, b2_ref, w3_ref, b3_ref, o_ref):
    # Transposed layout: batch on lanes, features on sublanes.
    x = x_ref[...]                                             # (1, tn)

    # Layer 1: K=1 contraction -> outer product on the VPU (broadcast mul).
    h1 = _sigmoid(w1_ref[...] * x + b1_ref[...])               # (128, tn)

    # Layer 2: dense 128x128 matmul on the MXU, full f32 passes.
    z2 = jnp.dot(w2_ref[...], h1,
                 preferred_element_type=jnp.float32,
                 precision=lax.Precision.HIGHEST)
    h2 = _sigmoid(z2 + b2_ref[...])                            # (128, tn)

    # Layer 3: M=1 row -> keep it OFF the MXU.  VPU multiply by the (128,1)
    # weight column + cross-sublane reduction (XLU), then bias + sigmoid.
    y = jnp.sum(h2 * w3_ref[...], axis=0, keepdims=True) + b3_ref[...]   # (1, tn)
    o_ref[...] = _sigmoid(y)


def prepare_params(params):
    """One-time conversion from PyTorch-style (in,out) layout to the kernel's
    transposed / column layout.  Call once; reuse across forward calls."""
    w1, b1, w2, b2, w3, b3 = params
    return (
        w1.T.astype(jnp.float32),                     # (128, 1)
        b1.reshape(HIDDEN, 1).astype(jnp.float32),    # (128, 1)
        w2.T.astype(jnp.float32),                     # (128, 128)
        b2.reshape(HIDDEN, 1).astype(jnp.float32),    # (128, 1)
        w3.astype(jnp.float32),                       # (128, 1) column (VPU use)
        b3.reshape(1, 1).astype(jnp.float32),         # (1, 1)
    )


def _full_spec(shape):
    nd = len(shape)
    return pl.BlockSpec(shape, lambda i, _nd=nd: (0,) * _nd)


def _choose_tile(n, tn):
    """Static (trace-time) tile selection: clamp for tiny batches, pad the
    batch to a tile multiple, and prefer >= 2 tiles so the 'parallel' grid
    axis can shard across v7x's two TensorCores (harmless on v5e/v6e)."""
    n128 = pl.cdiv(n, 128) * 128
    tn_eff = min(tn, n128)
    if n128 >= 256 and n128 <= tn_eff:
        tn_eff = pl.cdiv(n128 // 2, 128) * 128        # split into ~2 tiles
    n_pad = pl.cdiv(n, tn_eff) * tn_eff
    return tn_eff, n_pad


@functools.partial(jax.jit, static_argnames=("tn",))
def mlp_forward(x, kparams, *, tn=2048):
    """x: (N, 1) float32; kparams: output of prepare_params()."""
    w1t, b1t, w2t, b2t, w3c, b3t = kparams
    assert tn % 128 == 0
    n = x.shape[0]

    tn_eff, n_pad = _choose_tile(n, tn)
    grid = (n_pad // tn_eff,)

    # Batch on lanes: (N,1) -> (1,N), zero-pad tail lanes.  Padded lanes just
    # compute sigmoid of zeros and are sliced off; nothing accumulates across
    # lanes, so the padding is harmless (don't add lane reductions later!).
    xt = x.reshape(n, 1).T.astype(jnp.float32)                 # (1, N)
    if n_pad != n:
        xt = jnp.pad(xt, ((0, 0), (0, n_pad - n)))             # (1, n_pad)

    # Advisory cost hint so XLA schedules the surrounding glue sensibly.
    flops = (2 * HIDDEN * HIDDEN + 4 * HIDDEN + 2) * n_pad
    transcendentals = (2 * HIDDEN + 1) * n_pad
    weight_bytes = 4 * (HIDDEN * HIDDEN + 5 * HIDDEN + 1)
    cost = pl.CostEstimate(flops=flops, transcendentals=transcendentals,
                           bytes_accessed=8 * n_pad + weight_bytes)

    out_t = pl.pallas_call(
        mlp_kernel,
        out_shape=jax.ShapeDtypeStruct((1, n_pad), jnp.float32),
        grid_spec=pltpu.PrefetchScalarGridSpec(
            num_scalar_prefetch=0,
            grid=grid,
            in_specs=[
                pl.BlockSpec((1, tn_eff), lambda i: (0, i)),   # x tile (lane-dense)
                _full_spec(w1t.shape), _full_spec(b1t.shape),  # resident weights
                _full_spec(w2t.shape), _full_spec(b2t.shape),
                _full_spec(w3c.shape), _full_spec(b3t.shape),
            ],
            out_specs=pl.BlockSpec((1, tn_eff), lambda i: (0, i)),
        ),
        compiler_params=pltpu.CompilerParams(
            dimension_semantics=("parallel",)),
        cost_estimate=cost,
    )(xt, w1t, b1t, w2t, b2t, w3c, b3t)

    return out_t[:, :n].T                                      # (N, 1)


def init_params(key):
    # PyTorch default Linear init: U(-1/sqrt(fan_in), +1/sqrt(fan_in)).
    ks = jax.random.split(key, 6)

    def linear(kw, kb, fan_in, fan_out):
        bound = 1.0 / jnp.sqrt(fan_in)
        w = jax.random.uniform(kw, (fan_in, fan_out), jnp.float32, -bound, bound)
        b = jax.random.uniform(kb, (1, fan_out), jnp.float32, -bound, bound)
        return w, b

    w1, b1 = linear(ks[0], ks[1], 1, 128)
    w2, b2 = linear(ks[2], ks[3], 128, 128)
    w3, b3 = linear(ks[4], ks[5], 128, 1)
    return (w1, b1, w2, b2, w3, b3)


def reference_forward(x, params):
    w1, b1, w2, b2, w3, b3 = params
    hp = lax.Precision.HIGHEST
    h1 = jax.nn.sigmoid(jnp.dot(x, w1, precision=hp) + b1)
    h2 = jax.nn.sigmoid(jnp.dot(h1, w2, precision=hp) + b2)
    return jax.nn.sigmoid(jnp.dot(h2, w3, precision=hp) + b3)


if __name__ == "__main__":
    key = jax.random.PRNGKey(0)
    kp, kx = jax.random.split(key)
    params = init_params(kp)
    kparams = prepare_params(params)

    # Small shape consistent with the module (batch=8, in_features=1).
    x = jax.random.normal(kx, (8, 1), jnp.float32)
    out = jax.block_until_ready(mlp_forward(x, kparams))
    ref = reference_forward(x, params)
    assert out.shape == (8, 1)
    assert jnp.allclose(out, ref, atol=1e-5, rtol=1e-5)

    # Non-tile-aligned larger batch: exercises padding and a >=2-tile grid
    # (both v7x TensorCores usable via the "parallel" axis).
    x2 = jax.random.normal(jax.random.PRNGKey(1), (300, 1), jnp.float32)
    out2 = jax.block_until_ready(mlp_forward(x2, kparams))
    assert jnp.allclose(out2, reference_forward(x2, params), atol=1e-5, rtol=1e-5)

    print("KERNEL_OK")
</pallas_src>

<mosaic_0001>
module attributes {stable_mosaic.version = 11 : i64} {
  func.func @mlp_kernel(%arg0: i32, %arg1: memref<1x128xf32, #tpu.memory_space<vmem>>, %arg2: memref<128x1xf32, #tpu.memory_space<vmem>>, %arg3: memref<128x1xf32, #tpu.memory_space<vmem>>, %arg4: memref<128x128xf32, #tpu.memory_space<vmem>>, %arg5: memref<128x1xf32, #tpu.memory_space<vmem>>, %arg6: memref<128x1xf32, #tpu.memory_space<vmem>>, %arg7: memref<1x1xf32, #tpu.memory_space<vmem>>, %arg8: memref<1x128xf32, #tpu.memory_space<vmem>>) attributes {dimension_semantics = [#tpu.dimension_semantics<parallel>], iteration_bounds = array<i64: 1>, scalar_prefetch = 0 : i64, scratch_operands = 0 : i64, tpu.core_type = #tpu.core_type<tc>, window_params = [{transform_indices = @transform_0, window_bounds = array<i64: 1, 128>}, {pipeline_mode = #tpu.pipeline_mode<synchronous>, transform_indices = @transform_1, window_bounds = array<i64: 128, 1>}, {pipeline_mode = #tpu.pipeline_mode<synchronous>, transform_indices = @transform_2, window_bounds = array<i64: 128, 1>}, {pipeline_mode = #tpu.pipeline_mode<synchronous>, transform_indices = @transform_3, window_bounds = array<i64: 128, 128>}, {pipeline_mode = #tpu.pipeline_mode<synchronous>, transform_indices = @transform_4, window_bounds = array<i64: 128, 1>}, {pipeline_mode = #tpu.pipeline_mode<synchronous>, transform_indices = @transform_5, window_bounds = array<i64: 128, 1>}, {pipeline_mode = #tpu.pipeline_mode<synchronous>, transform_indices = @transform_6, window_bounds = array<i64: 1, 1>}, {transform_indices = @transform_7, window_bounds = array<i64: 1, 128>}]} {
    %c0 = arith.constant 0 : index
    %c0_0 = arith.constant 0 : index
    %0 = vector.load %arg1[%c0, %c0_0] : memref<1x128xf32, #tpu.memory_space<vmem>>, vector<1x128xf32>
    %c0_1 = arith.constant 0 : index
    %c0_2 = arith.constant 0 : index
    %1 = vector.load %arg2[%c0_1, %c0_2] : memref<128x1xf32, #tpu.memory_space<vmem>>, vector<128x1xf32>
    %2 = vector.broadcast %1 : vector<128x1xf32> to vector<128x128xf32>
    %3 = vector.broadcast %0 : vector<1x128xf32> to vector<128x128xf32>
    %4 = arith.mulf %2, %3 : vector<128x128xf32>
    %c0_3 = arith.constant 0 : index
    %c0_4 = arith.constant 0 : index
    %5 = vector.load %arg3[%c0_3, %c0_4] : memref<128x1xf32, #tpu.memory_space<vmem>>, vector<128x1xf32>
    %6 = vector.broadcast %5 : vector<128x1xf32> to vector<128x128xf32>
    %7 = arith.addf %4, %6 : vector<128x128xf32>
    %cst = arith.constant 5.000000e-01 : f32
    %8 = vector.broadcast %cst : f32 to vector<128x128xf32>
    %9 = arith.mulf %8, %7 : vector<128x128xf32>
    %10 = math.tanh %9 : vector<128x128xf32>
    %cst_5 = arith.constant 5.000000e-01 : f32
    %11 = vector.broadcast %cst_5 : f32 to vector<128x128xf32>
    %12 = arith.mulf %11, %10 : vector<128x128xf32>
    %cst_6 = arith.constant 5.000000e-01 : f32
    %13 = vector.broadcast %cst_6 : f32 to vector<128x128xf32>
    %14 = arith.addf %12, %13 : vector<128x128xf32>
    %c0_7 = arith.constant 0 : index
    %c0_8 = arith.constant 0 : index
    %15 = vector.load %arg4[%c0_7, %c0_8] : memref<128x128xf32, #tpu.memory_space<vmem>>, vector<128x128xf32>
    %cst_9 = arith.constant dense<0.000000e+00> : vector<128x128xf32>
    %16 = tpu.matmul %15, %14, %cst_9 {dimension_numbers = #tpu.dot_dimension_numbers<[1], [0], [0], [1], [0, 0, 1, 1], [], []>, precision = #tpu.contract_precision<fp32>} : vector<128x128xf32>, vector<128x128xf32>, vector<128x128xf32> -> vector<128x128xf32>
    %c0_10 = arith.constant 0 : index
    %c0_11 = arith.constant 0 : index
    %17 = vector.load %arg5[%c0_10, %c0_11] : memref<128x1xf32, #tpu.memory_space<vmem>>, vector<128x1xf32>
    %18 = vector.broadcast %17 : vector<128x1xf32> to vector<128x128xf32>
    %19 = arith.addf %16, %18 : vector<128x128xf32>
    %cst_12 = arith.constant 5.000000e-01 : f32
    %20 = vector.broadcast %cst_12 : f32 to vector<128x128xf32>
    %21 = arith.mulf %20, %19 : vector<128x128xf32>
    %22 = math.tanh %21 : vector<128x128xf32>
    %cst_13 = arith.constant 5.000000e-01 : f32
    %23 = vector.broadcast %cst_13 : f32 to vector<128x128xf32>
    %24 = arith.mulf %23, %22 : vector<128x128xf32>
    %cst_14 = arith.constant 5.000000e-01 : f32
    %25 = vector.broadcast %cst_14 : f32 to vector<128x128xf32>
    %26 = arith.addf %24, %25 : vector<128x128xf32>
    %c0_15 = arith.constant 0 : index
    %c0_16 = arith.constant 0 : index
    %27 = vector.load %arg6[%c0_15, %c0_16] : memref<128x1xf32, #tpu.memory_space<vmem>>, vector<128x1xf32>
    %28 = vector.broadcast %27 : vector<128x1xf32> to vector<128x128xf32>
    %29 = arith.mulf %26, %28 : vector<128x128xf32>
    %cst_17 = arith.constant dense<0.000000e+00> : vector<128xf32>
    %30 = vector.multi_reduction <add>, %29, %cst_17 [0] : vector<128x128xf32> to vector<128xf32>
    %31 = vector.shape_cast %30 : vector<128xf32> to vector<1x128xf32>
    %c0_18 = arith.constant 0 : index
    %c0_19 = arith.constant 0 : index
    %32 = vector.load %arg7[%c0_18, %c0_19] : memref<1x1xf32, #tpu.memory_space<vmem>>, vector<1x1xf32>
    %33 = vector.broadcast %32 : vector<1x1xf32> to vector<1x128xf32>
    %34 = arith.addf %31, %33 : vector<1x128xf32>
    %cst_20 = arith.constant 5.000000e-01 : f32
    %35 = vector.broadcast %cst_20 : f32 to vector<1x128xf32>
    %36 = arith.mulf %35, %34 : vector<1x128xf32>
    %37 = math.tanh %36 : vector<1x128xf32>
    %cst_21 = arith.constant 5.000000e-01 : f32
    %38 = vector.broadcast %cst_21 : f32 to vector<1x128xf32>
    %39 = arith.mulf %38, %37 : vector<1x128xf32>
    %cst_22 = arith.constant 5.000000e-01 : f32
    %40 = vector.broadcast %cst_22 : f32 to vector<1x128xf32>
    %41 = arith.addf %39, %40 : vector<1x128xf32>
    %c0_23 = arith.constant 0 : index
    %c0_24 = arith.constant 0 : index
    %42 = vector.load %arg8[%c0_23, %c0_24] : memref<1x128xf32, #tpu.memory_space<vmem>>, vector<1x128xf32>
    tpu.vector_store %arg8[%c0_23, %c0_24], %41 {strides = array<i32>} : memref<1x128xf32, #tpu.memory_space<vmem>>, vector<1x128xf32>,
    return
  }
  func.func @transform_0(%arg0: i32) -> (i32, i32) {
    %c0_i32 = arith.constant 0 : i32
    %c0_i32_0 = arith.constant 0 : i32
    return %c0_i32, %arg0 : i32, i32
  }
  func.func @transform_1(%arg0: i32) -> (i32, i32) {
    %c0_i32 = arith.constant 0 : i32
    %c0_i32_0 = arith.constant 0 : i32
    %c0_i32_1 = arith.constant 0 : i32
    return %c0_i32, %c0_i32_0 : i32, i32
  }
  func.func @transform_2(%arg0: i32) -> (i32, i32) {
    %c0_i32 = arith.constant 0 : i32
    %c0_i32_0 = arith.constant 0 : i32
    %c0_i32_1 = arith.constant 0 : i32
    return %c0_i32, %c0_i32_0 : i32, i32
  }
  func.func @transform_3(%arg0: i32) -> (i32, i32) {
    %c0_i32 = arith.constant 0 : i32
    %c0_i32_0 = arith.constant 0 : i32
    %c0_i32_1 = arith.constant 0 : i32
    return %c0_i32, %c0_i32_0 : i32, i32
  }
  func.func @transform_4(%arg0: i32) -> (i32, i32) {
    %c0_i32 = arith.constant 0 : i32
    %c0_i32_0 = arith.constant 0 : i32
    %c0_i32_1 = arith.constant 0 : i32
    return %c0_i32, %c0_i32_0 : i32, i32
  }
  func.func @transform_5(%arg0: i32) -> (i32, i32) {
    %c0_i32 = arith.constant 0 : i32
    %c0_i32_0 = arith.constant 0 : i32
    %c0_i32_1 = arith.constant 0 : i32
    return %c0_i32, %c0_i32_0 : i32, i32
  }
  func.func @transform_6(%arg0: i32) -> (i32, i32) {
    %c0_i32 = arith.constant 0 : i32
    %c0_i32_0 = arith.constant 0 : i32
    %c0_i32_1 = arith.constant 0 : i32
    return %c0_i32, %c0_i32_0 : i32, i32
  }
  func.func @transform_7(%arg0: i32) -> (i32, i32) {
    %c0_i32 = arith.constant 0 : i32
    %c0_i32_0 = arith.constant 0 : i32
    return %c0_i32, %arg0 : i32, i32
  }
}

</mosaic_0001>

<bundles_post_ra>
// kernel: mlp_forward.1
= control target key start
LH: loop header
LB: loop body
LE: loop exit
PB: predicated region body
PF: predicated region fallthrough
CT: control target
= control target key end

     0   :  { %v1555_v0 = vmov 0   ;;  %s2412_s2 = inlined_call_operand.vmem [shape: f32[128,1], index: 2, kind: input, shape index: {}]   ;;  %s2413_s1 = inlined_call_operand.vmem [shape: f32[128,1], index: 1, kind: input, shape index: {}]   ;;  %s2414_s0 = inlined_call_operand.vmem [shape: f32[1,128], index: 0, kind: input, shape index: {}]   ;;  %s2415_s4 = inlined_call_operand.vmem [shape: f32[128,1], index: 4, kind: input, shape index: {}]   ;;  %s2416_s5 = inlined_call_operand.vmem [shape: f32[128,1], index: 5, kind: input, shape index: {}]   ;;  %s2417_s6 = inlined_call_operand.<no memory space> [shape: f32[1,1], index: 6, kind: input, shape index: {}]   ;;  %s2418_s3 = inlined_call_operand.vmem [shape: f32[128,128], index: 3, kind: input, shape index: {}]   ;;  %s2419_s7 = inlined_call_operand.vmem [shape: f32[1,128], index: 7, kind: output, shape index: {}]  }
   0x1   :  { %1487 = vset.pattern.permute.xlu2 %v1555_v0  ;;  %1486 = vset.pattern.permute.xlu1 %v1555_v0  ;;  %v159_v1 = vld [vmem:[%s2412_s2 + $0x78] sm:$0xff]  ;;  %v158_v2 = vld [vmem:[%s2412_s2 + $0x70] sm:$0xff]  ;;  %v42_v4 = vld [vmem:[%s2413_s1 + $0x68] sm:$0xff] }
   0x2   :  { %v44_v3 = vld [vmem:[%s2413_s1 + $0x78] sm:$0xff]  ;;  %1485 = vset.pattern.permute.xlu0 %v1555_v0  ;;  %237 = vperm.xlu1 %1486, %v159_v1   ;;  %v43_v5 = vld [vmem:[%s2413_s1 + $0x70] sm:$0xff]  ;;  %v41_v6 = vld [vmem:[%s2413_s1 + $0x60] sm:$0xff] }
   0x3   :  { %232 = vperm.xlu2 %1487, %v158_v2   ;;  %122 = vperm.xlu0 %1485, %v44_v3   ;;  %v40_v7 = vld [vmem:[%s2413_s1 + $0x58] sm:$0xff]  ;;  %v157_v8 = vld [vmem:[%s2412_s2 + $0x68] sm:$0xff]  ;;  %v156_v9 = vld [vmem:[%s2412_s2 + $0x60] sm:$0xff] }
   0x4   :  { %v155_v10 = vld [vmem:[%s2412_s2 + $0x58] sm:$0xff]  ;;  %v39_v11 = vld [vmem:[%s2413_s1 + $0x50] sm:$0xff]  ;;  %v38_v12 = vld [vmem:[%s2413_s1 + $0x48] sm:$0xff] }
   0x5   :  { %v37_v13 = vld [vmem:[%s2413_s1 + $0x40] sm:$0xff]  ;;  %v154_v14 = vld [vmem:[%s2412_s2 + $0x50] sm:$0xff]  ;;  %v153_v15 = vld [vmem:[%s2412_s2 + $0x48] sm:$0xff] }
   0x6   :  { %v152_v16 = vld [vmem:[%s2412_s2 + $0x40] sm:$0xff]  ;;  %v36_v17 = vld [vmem:[%s2413_s1 + $0x38] sm:$0xff]  ;;  %v35_v18 = vld [vmem:[%s2413_s1 + $0x30] sm:$0xff] }
   0x7   :  { %v34_v19 = vld [vmem:[%s2413_s1 + $0x28] sm:$0xff]  ;;  %v151_v20 = vld [vmem:[%s2412_s2 + $0x38] sm:$0xff]  ;;  %v150_v21 = vld [vmem:[%s2412_s2 + $0x30] sm:$0xff] }
   0x8   :  { %v149_v22 = vld [vmem:[%s2412_s2 + $0x28] sm:$0xff]  ;;  %v33_v23 = vld [vmem:[%s2413_s1 + $0x20] sm:$0xff]  ;;  %v32_v24 = vld [vmem:[%s2413_s1 + $0x18] sm:$0xff] }
   0x9   :  { %v31_v25 = vld [vmem:[%s2413_s1 + $0x10] sm:$0xff]  ;;  %v148_v26 = vld [vmem:[%s2412_s2 + $0x20] sm:$0xff]  ;;  %v147_v27 = vld [vmem:[%s2412_s2 + $0x18] sm:$0xff] }
   0xa   :  { %112 = vperm.xlu1 %1486, %v42_v4   ;;  %v146_v28 = vld [vmem:[%s2412_s2 + $0x10] sm:$0xff]  ;;  %v30_v29 = vld [vmem:[%s2413_s1 + $0x8] sm:$0xff]  ;;  %v29_v30 = vld [vmem:[%s2413_s1] sm:$0xff] }
   0xb   :  { %117 = vperm.xlu0 %1485, %v43_v5   ;;  %107 = vperm.xlu2 %1487, %v41_v6   ;;  %v144_v31 = vld [vmem:[%s2412_s2] sm:$0xff]  ;;  %v145_v32 = vld [vmem:[%s2412_s2 + $0x8] sm:$0xff]  ;;  %v338_v34 = vld [vmem:[%s2415_s4 + $0x10] sm:$0xff] }
   0xc   :  { %v336_v33 = vld [vmem:[%s2415_s4] sm:$0xff]  ;;  %v337_v35 = vld [vmem:[%s2415_s4 + $0x8] sm:$0xff]  ;;  %v339_v36 = vld [vmem:[%s2415_s4 + $0x18] sm:$0xff] }
   0xd   :  { %v341_v38 = vld [vmem:[%s2415_s4 + $0x28] sm:$0xff]  ;;  %v340_v39 = vld [vmem:[%s2415_s4 + $0x20] sm:$0xff]  ;;  %v342_v40 = vld [vmem:[%s2415_s4 + $0x30] sm:$0xff] }
   0xe   :  { %v344_v42 = vld [vmem:[%s2415_s4 + $0x40] sm:$0xff]  ;;  %v343_v43 = vld [vmem:[%s2415_s4 + $0x38] sm:$0xff]  ;;  %v345_v44 = vld [vmem:[%s2415_s4 + $0x48] sm:$0xff] }
   0xf   :  { %v347_v46 = vld [vmem:[%s2415_s4 + $0x58] sm:$0xff]  ;;  %v1728_v47 = vld [vmem:[%s2414_s0] ss:$0 sm:$0xff]  ;;  %v346_v48 = vld [vmem:[%s2415_s4 + $0x50] sm:$0xff] }
  0x10   :  { %v348_v49 = vld [vmem:[%s2415_s4 + $0x60] sm:$0xff]  ;;  %v350_v56 = vld [vmem:[%s2415_s4 + $0x70] sm:$0xff]  ;;  %v349_v58 = vld [vmem:[%s2415_s4 + $0x68] sm:$0xff] }
  0x11   :  { %v351_v59 = vld [vmem:[%s2415_s4 + $0x78] sm:$0xff]  ;;  %v1303_v2 = vld [vmem:[%s2416_s5 + $0x8] sm:$0xff]  ;;  %v1302_v4 = vld [vmem:[%s2416_s5] sm:$0xff] }
  0x12   :  { %102 = vperm.xlu1 %1486, %v40_v7   ;;  %v1304_v5 = vld [vmem:[%s2416_s5 + $0x10] sm:$0xff] }
  0x13   :  { %227 = vperm.xlu0 %1485, %v157_v8   ;;  %222 = vperm.xlu2 %1487, %v156_v9  }
  0x1a   :  { %217 = vperm.xlu1 %1486, %v155_v10   ;;  %v12_v10 = vstv %s2417_s6 }
  0x1b   :  { %97 = vperm.xlu0 %1485, %v39_v11   ;;  %92 = vperm.xlu2 %1487, %v38_v12   ;;  %13 = vst [vmem:[#allocation2] sm:$0x1] %v12_v10 }
  0x22   :  { %87 = vperm.xlu1 %1486, %v37_v13  }
  0x23   :  { %212 = vperm.xlu0 %1485, %v154_v14   ;;  %207 = vperm.xlu2 %1487, %v153_v15  }
  0x2a   :  { %202 = vperm.xlu1 %1486, %v152_v16  }
  0x2b   :  { %82 = vperm.xlu0 %1485, %v36_v17   ;;  %77 = vperm.xlu2 %1487, %v35_v18  }
  0x32   :  { %72 = vperm.xlu1 %1486, %v34_v19  }
  0x33   :  { %197 = vperm.xlu0 %1485, %v151_v20   ;;  %192 = vperm.xlu2 %1487, %v150_v21   ;;  %v1306_v21 = vld [vmem:[%s2416_s5 + $0x20] sm:$0xff] }
  0x3a   :  { %187 = vperm.xlu1 %1486, %v149_v22  }
  0x3b   :  { %67 = vperm.xlu0 %1485, %v33_v23   ;;  %62 = vperm.xlu2 %1487, %v32_v24   ;;  %v1305_v23 = vld [vmem:[%s2416_s5 + $0x18] sm:$0xff]  ;;  %v1307_v24 = vld [vmem:[%s2416_s5 + $0x28] sm:$0xff] }
  0x42   :  { %57 = vperm.xlu1 %1486, %v31_v25  }
  0x43   :  { %182 = vperm.xlu0 %1485, %v148_v26   ;;  %177 = vperm.xlu2 %1487, %v147_v27  }
  0x4a   :  { %172 = vperm.xlu1 %1486, %v146_v28  }
  0x4b   :  { %52 = vperm.xlu0 %1485, %v30_v29   ;;  %47 = vperm.xlu2 %1487, %v29_v30  }
  0x52   :  { %162 = vperm.xlu1 %1486, %v144_v31  }
  0x53   :  { %167 = vperm.xlu0 %1485, %v145_v32   ;;  %354 = vperm.xlu2 %1487, %v336_v33  }
  0x5a   :  { %364 = vperm.xlu1 %1486, %v338_v34  }
  0x5b   :  { %359 = vperm.xlu0 %1485, %v337_v35   ;;  %369 = vperm.xlu2 %1487, %v339_v36  }
  0x5d   :  { %v233_v37 = vpop.permute.xlu2 %232 }
  0x62   :  { %379 = vperm.xlu1 %1486, %v341_v38  }
  0x63   :  { %374 = vperm.xlu0 %1485, %v340_v39   ;;  %384 = vperm.xlu2 %1487, %v342_v40  }
  0x65   :  { %v108_v41 = vpop.permute.xlu2 %107 }
  0x66   :  { %v140_v50 = vmul.f32 %v1728_v47, %v108_v41 }
  0x6a   :  { %394 = vperm.xlu1 %1486, %v344_v42  }
  0x6b   :  { %389 = vperm.xlu0 %1485, %v343_v43   ;;  %399 = vperm.xlu2 %1487, %v345_v44   ;;  %v1309_v43 = vld [vmem:[%s2416_s5 + $0x38] sm:$0xff]  ;;  %v1308_v44 = vld [vmem:[%s2416_s5 + $0x30] sm:$0xff] }
  0x6d   :  { %v223_v45 = vpop.permute.xlu2 %222 }
  0x6e   :  { %v252_v54 = vadd.f32 %v223_v45, %v140_v50 }
  0x70   :  { %v268_v60 = vmul.f32 0.5, %v252_v54 }
  0x72   :  { %409 = vperm.xlu1 %1486, %v347_v46   ;;  %v1310_v46 = vld [vmem:[%s2416_s5 + $0x40] sm:$0xff] }
  0x73   :  { %404 = vperm.xlu0 %1485, %v346_v48   ;;  %414 = vperm.xlu2 %1487, %v348_v49  }
  0x74   :  { %v238_v51 = vpop.permute.xlu1 %237 }
  0x75   :  { %v123_v52 = vpop.permute.xlu0 %122  ;;  %v93_v53 = vpop.permute.xlu2 %92 }
  0x76   :  { %v143_v55 = vmul.f32 %v1728_v47, %v123_v52  ;;  %v137_v7 = vmul.f32 %v1728_v47, %v93_v53 }
  0x78   :  { %v255_v57 = vadd.f32 %v238_v51, %v143_v55 }
  0x7a   :  { %v271_v61 = vmul.f32 0.5, %v255_v57  ;;  %424 = vperm.xlu1 %1486, %v350_v56  }
  0x7b   :  { %419 = vperm.xlu0 %1485, %v349_v58   ;;  %429 = vperm.xlu2 %1487, %v351_v59  }
  0x7c   :  { %1489 = vtanh.f32 %v271_v61  ;;  %v113_v62 = vpop.permute.xlu1 %112 }
  0x7d   :  { %v118_v63 = vpop.permute.xlu0 %117  ;;  %v208_v0 = vpop.permute.xlu2 %207  ;;  %1491 = vtanh.f32 %v268_v60  ;;  %v141_v12 = vmul.f32 %v1728_v47, %v113_v62 }
  0x7e   :  { %v142_v1 = vmul.f32 %v1728_v47, %v118_v63  ;;  %v249_v17 = vadd.f32 %v208_v0, %v137_v7  ;;  %v1313_v7 = vld [vmem:[%s2416_s5 + $0x58] sm:$0xff] }
  0x80   :  { %v254_v3 = vadd.f32 %v233_v37, %v142_v1  ;;  %v265_v27 = vmul.f32 0.5, %v249_v17 }
  0x82   :  { %v1490_v6 = vpop.eup %1489  ;;  %v270_v8 = vmul.f32 0.5, %v254_v3  ;;  %1325 = vperm.xlu1 %1486, %v1303_v2  }
  0x83   :  { %v303_v9 = vmul.f32 0.5, %v1490_v6  ;;  %1320 = vperm.xlu0 %1485, %v1302_v4   ;;  %1330 = vperm.xlu2 %1487, %v1304_v5   ;;  %v1492_v11 = vpop.eup %1491  ;;  %v1312_v4 = vld [vmem:[%s2416_s5 + $0x50] sm:$0xff]  ;;  %v1311_v5 = vld [vmem:[%s2416_s5 + $0x48] sm:$0xff] }
  0x84   :  { %1493 = vtanh.f32 %v270_v8  ;;  %v103_v13 = vpop.permute.xlu1 %102  ;;  %v300_v19 = vmul.f32 0.5, %v1492_v11 }
  0x85   :  { %v319_v14 = vadd.f32 0.5, %v303_v9  ;;  %v228_v15 = vpop.permute.xlu0 %227  ;;  %v78_v16 = vpop.permute.xlu2 %77  ;;  %v139_v30 = vmul.f32 %v1728_v47, %v103_v13 }
  0x86   :  { %v253_v18 = vadd.f32 %v228_v15, %v141_v12  ;;  %v316_v28 = vadd.f32 0.5, %v300_v19  ;;  %v134_v53 = vmul.f32 %v1728_v47, %v78_v16 }
  0x87   :  { %v1762_v20 = vand.u32 4294901760, %v319_v14 }
  0x88   :  { %v269_v22 = vmul.f32 0.5, %v253_v18  ;;  %v1783_v37 = vand.u32 4294901760, %v316_v28 }
  0x89   :  { %433 = vmatpush.msra.mxu0 %v1762_v20  ;;  %1452 = vmatpush.msra.mxu2 %v1762_v20  ;;  %v1776_v25 = vsub.f32 %v319_v14, %v1762_v20 }
  0x8a   :  { %v1494_v26 = vpop.eup %1493  ;;  %1495 = vtanh.f32 %v269_v22  ;;  %1340 = vperm.xlu1 %1486, %v1306_v21   ;;  %v1802_v49 = vsub.f32 %v316_v28, %v1783_v37  ;;  %v1314_v28 = vld [vmem:[%s2416_s5 + $0x60] sm:$0xff] }
  0x8b   :  { %v302_v29 = vmul.f32 0.5, %v1494_v26  ;;  %1335 = vperm.xlu0 %1485, %v1305_v23   ;;  %1345 = vperm.xlu2 %1487, %v1307_v24   ;;  %v595_v31 = vand.u32 4294901760, %v1776_v25  ;;  %1497 = vtanh.f32 %v265_v27  ;;  %v1315_v27 = vld [vmem:[%s2416_s5 + $0x68] sm:$0xff] }
  0x8c   :  { %v218_v32 = vpop.permute.xlu1 %217  ;;  %v613_v1 = vand.u32 4294901760, %v1802_v49 }
  0x8d   :  { %v318_v33 = vadd.f32 0.5, %v302_v29  ;;  %v251_v34 = vadd.f32 %v218_v32, %v139_v30  ;;  %v98_v35 = vpop.permute.xlu0 %97  ;;  %v596_v36 = vsub.f32 %v1776_v25, %v595_v31  ;;  %v193_v40 = vpop.permute.xlu2 %192  ;;  %v1316_v32 = vld [vmem:[%s2416_s5 + $0x70] sm:$0xff] }
  0x8e   :  { %v138_v54 = vmul.f32 %v1728_v47, %v98_v35  ;;  %v246_v59 = vadd.f32 %v193_v40, %v134_v53  ;;  %v614_v14 = vsub.f32 %v1802_v49, %v613_v1 }
  0x8f   :  { %v1785_v38 = vand.u32 4294901760, %v318_v33  ;;  %v267_v39 = vmul.f32 0.5, %v251_v34  ;;  %v597_v41 = vand.u32 4294901760, %v596_v36 }
  0x90   :  { %v1496_v42 = vpop.eup %1495  ;;  %v262_v10 = vmul.f32 0.5, %v246_v59  ;;  %v615_v24 = vand.u32 4294901760, %v614_v14  ;;  %v1435_v59 = vld [vmem:[#allocation2] sm:$0x1] }
  0x91   :  { %v301_v45 = vmul.f32 0.5, %v1496_v42  ;;  %1499 = vtanh.f32 %v267_v39  ;;  %435 = vmatpush.msra.mxu0 %v1785_v38  ;;  %1453 = vmatpush.msra.mxu2 %v1785_v38  ;;  %v1799_v48 = vsub.f32 %v318_v33, %v1785_v38  ;;  %v1498_v52 = vpop.eup %1497 }
  0x92   :  { %598 = vmatpush.msra.mxu1 %v597_v41  ;;  %1468 = vmatpush.msra.mxu3 %v597_v41  ;;  %v297_v62 = vmul.f32 0.5, %v1498_v52 }
  0x93   :  { %v317_v50 = vadd.f32 0.5, %v301_v45  ;;  %1355 = vperm.xlu1 %1486, %v1309_v43   ;;  %1350 = vperm.xlu0 %1485, %v1308_v44   ;;  %v601_v51 = vand.u32 4294901760, %v1799_v48 }
  0x94   :  { %1360 = vperm.xlu2 %1487, %v1310_v46   ;;  %v88_v55 = vpop.permute.xlu1 %87  ;;  %v313_v11 = vadd.f32 0.5, %v297_v62 }
  0x95   :  { %v1807_v56 = vand.u32 4294901760, %v317_v50  ;;  %v213_v57 = vpop.permute.xlu0 %212  ;;  %v602_v58 = vsub.f32 %v1799_v48, %v601_v51  ;;  %v63_v6 = vpop.permute.xlu2 %62  ;;  %v136_v12 = vmul.f32 %v1728_v47, %v88_v55 }
  0x96   :  { %v250_v60 = vadd.f32 %v213_v57, %v138_v54  ;;  %v1844_v22 = vand.u32 4294901760, %v313_v11  ;;  %v131_v40 = vmul.f32 %v1728_v47, %v63_v6 }
  0x97   :  { %v1500_v61 = vpop.eup %1499  ;;  %v1813_v63 = vsub.f32 %v317_v50, %v1807_v56  ;;  %437 = vmatpush.msra.mxu0 %v1807_v56  ;;  %1454 = vmatpush.msra.mxu2 %v1807_v56  ;;  %v603_v0 = vand.u32 4294901760, %v602_v58 }
  0x98   :  { %v299_v2 = vmul.f32 0.5, %v1500_v61  ;;  %v266_v3 = vmul.f32 0.5, %v250_v60  ;;  %v1860_v34 = vsub.f32 %v313_v11, %v1844_v22  ;;  %v1317_v60 = vld [vmem:[%s2416_s5 + $0x78] sm:$0xff] }
  0x99   :  { %439 = vmatpush.msra.mxu0 %v1783_v37  ;;  %1455 = vmatpush.msra.mxu2 %v1783_v37  ;;  %v607_v8 = vand.u32 4294901760, %v1813_v63 }
  0x9a   :  { %v315_v9 = vadd.f32 0.5, %v299_v2  ;;  %1501 = vtanh.f32 %v266_v3  ;;  %604 = vmatpush.msra.mxu1 %v603_v0  ;;  %1469 = vmatpush.msra.mxu3 %v603_v0  ;;  %v631_v55 = vand.u32 4294901760, %v1860_v34 }
  0x9b   :  { %1370 = vperm.xlu1 %1486, %v1312_v4   ;;  %1365 = vperm.xlu0 %1485, %v1311_v5   ;;  %v608_v13 = vsub.f32 %v1813_v63, %v607_v8  ;;  %1503 = vtanh.f32 %v262_v10 }
  0x9c   :  { %v1837_v15 = vand.u32 4294901760, %v315_v9  ;;  %1375 = vperm.xlu2 %1487, %v1313_v7   ;;  %v203_v16 = vpop.permute.xlu1 %202  ;;  %v632_v5 = vsub.f32 %v1860_v34, %v631_v55 }
  0x9d   :  { %v248_v17 = vadd.f32 %v203_v16, %v136_v12  ;;  %v83_v18 = vpop.permute.xlu0 %82  ;;  %v609_v19 = vand.u32 4294901760, %v608_v13  ;;  %v178_v36 = vpop.permute.xlu2 %177 }
  0x9e   :  { %v1840_v21 = vsub.f32 %v315_v9, %v1837_v15  ;;  %441 = vmatpush.msra.mxu0 %v1837_v15  ;;  %1456 = vmatpush.msra.mxu2 %v1837_v15  ;;  %v135_v41 = vmul.f32 %v1728_v47, %v83_v18  ;;  %v243_v46 = vadd.f32 %v178_v36, %v131_v40  ;;  %v633_v16 = vand.u32 4294901760, %v632_v5 }
  0x9f   :  { %v264_v23 = vmul.f32 0.5, %v248_v17  ;;  %610 = vmatpush.msra.mxu1 %v609_v19  ;;  %1470 = vmatpush.msra.mxu3 %v609_v19 }
  0xa0   :  { %v1502_v26 = vpop.eup %1501  ;;  %v619_v29 = vand.u32 4294901760, %v1840_v21  ;;  %v259_v0 = vmul.f32 0.5, %v243_v46 }
  0xa1   :  { %v298_v30 = vmul.f32 0.5, %v1502_v26  ;;  %1505 = vtanh.f32 %v264_v23  ;;  %616 = vmatpush.msra.mxu1 %v615_v24  ;;  %1471 = vmatpush.msra.mxu3 %v615_v24  ;;  %v1504_v39 = vpop.eup %1503 }
  0xa2   :  { %v620_v33 = vsub.f32 %v1840_v21, %v619_v29  ;;  %v294_v53 = vmul.f32 0.5, %v1504_v39 }
  0xa3   :  { %v314_v35 = vadd.f32 0.5, %v298_v30  ;;  %1385 = vperm.xlu1 %1486, %v1315_v27   ;;  %1380 = vperm.xlu0 %1485, %v1314_v28  }
  0xa4   :  { %1390 = vperm.xlu2 %1487, %v1316_v32   ;;  %v73_v42 = vpop.permute.xlu1 %72  ;;  %v621_v43 = vand.u32 4294901760, %v620_v33  ;;  %v310_v2 = vadd.f32 0.5, %v294_v53 }
  0xa5   :  { %v1864_v44 = vand.u32 4294901760, %v314_v35  ;;  %v198_v45 = vpop.permute.xlu0 %197  ;;  %v133_v3 = vmul.f32 %v1728_v47, %v73_v42 }
  0xa6   :  { %v247_v50 = vadd.f32 %v198_v45, %v135_v41  ;;  %622 = vmatpush.msra.mxu1 %v621_v43  ;;  %1472 = vmatpush.msra.mxu3 %v621_v43  ;;  %v1892_v13 = vand.u32 4294901760, %v310_v2 }
  0xa7   :  { %v1506_v52 = vpop.eup %1505  ;;  %v1867_v54 = vsub.f32 %v314_v35, %v1864_v44  ;;  %443 = vmatpush.msra.mxu0 %v1864_v44  ;;  %1457 = vmatpush.msra.mxu2 %v1864_v44 }
  0xa8   :  { %v296_v57 = vmul.f32 0.5, %v1506_v52  ;;  %v263_v58 = vmul.f32 0.5, %v247_v50  ;;  %v1899_v24 = vsub.f32 %v310_v2, %v1892_v13 }
  0xa9   :  { %445 = vmatpush.msra.mxu0 %v1844_v22  ;;  %1458 = vmatpush.msra.mxu2 %v1844_v22  ;;  %v625_v61 = vand.u32 4294901760, %v1867_v54 }
  0xaa   :  { %v312_v62 = vadd.f32 0.5, %v296_v57  ;;  %1507 = vtanh.f32 %v263_v58  ;;  %v649_v42 = vand.u32 4294901760, %v1899_v24 }
  0xab   :  { %1438 = vperm.xlu1 %1486, %v1435_v59   ;;  %1395 = vperm.xlu0 %1485, %v1317_v60   ;;  %v626_v4 = vsub.f32 %v1867_v54, %v625_v61  ;;  %1509 = vtanh.f32 %v259_v0 }
  0xac   :  { %v1885_v6 = vand.u32 4294901760, %v312_v62  ;;  %v188_v7 = vpop.permute.xlu1 %187  ;;  %v650_v58 = vsub.f32 %v1899_v24, %v649_v42 }
  0xad   :  { %v245_v9 = vadd.f32 %v188_v7, %v133_v3  ;;  %v68_v10 = vpop.permute.xlu0 %67  ;;  %v627_v11 = vand.u32 4294901760, %v626_v4 }
  0xae   :  { %v1888_v12 = vsub.f32 %v312_v62, %v1885_v6  ;;  %447 = vmatpush.msra.mxu0 %v1885_v6  ;;  %1459 = vmatpush.msra.mxu2 %v1885_v6  ;;  %v132_v28 = vmul.f32 %v1728_v47, %v68_v10  ;;  %v651_v7 = vand.u32 4294901760, %v650_v58  ;;  %v48_v10 = vpop.permute.xlu2 %47 }
  0xaf   :  { %v261_v14 = vmul.f32 0.5, %v245_v9  ;;  %628 = vmatpush.msra.mxu1 %v627_v11  ;;  %1473 = vmatpush.msra.mxu3 %v627_v11 }
  0xb0   :  { %v1508_v17 = vpop.eup %1507  ;;  %v637_v18 = vand.u32 4294901760, %v1888_v12 }
  0xb1   :  { %v295_v19 = vmul.f32 0.5, %v1508_v17  ;;  %1511 = vtanh.f32 %v261_v14  ;;  %634 = vmatpush.msra.mxu1 %v633_v16  ;;  %1474 = vmatpush.msra.mxu3 %v633_v16  ;;  %v1510_v27 = vpop.eup %1509 }
  0xb2   :  { %v638_v23 = vsub.f32 %v1888_v12, %v637_v18  ;;  %v291_v40 = vmul.f32 0.5, %v1510_v27  ;;  %v328_v27 = vld [vmem:[%s2418_s3 + $0x40] sm:$0xff] }
  0xb3   :  { %v311_v26 = vadd.f32 0.5, %v295_v19  ;;  %v128_v19 = vmul.f32 %v1728_v47, %v48_v10  ;;  %v321_v10 = vld [vmem:[%s2418_s3 + $0x8] sm:$0xff] }
  0xb4   :  { %v58_v30 = vpop.permute.xlu1 %57  ;;  %v639_v32 = vand.u32 4294901760, %v638_v23  ;;  %v307_v52 = vadd.f32 0.5, %v291_v40 }
  0xb5   :  { %v1902_v33 = vand.u32 4294901760, %v311_v26  ;;  %v183_v35 = vpop.permute.xlu0 %182  ;;  %v130_v53 = vmul.f32 %v1728_v47, %v58_v30 }
  0xb6   :  { %v244_v36 = vadd.f32 %v183_v35, %v132_v28  ;;  %640 = vmatpush.msra.mxu1 %v639_v32  ;;  %1475 = vmatpush.msra.mxu3 %v639_v32  ;;  %v1927_v4 = vand.u32 4294901760, %v307_v52 }
  0xb7   :  { %v1512_v39 = vpop.eup %1511  ;;  %v1905_v41 = vsub.f32 %v311_v26, %v1902_v33  ;;  %449 = vmatpush.msra.mxu0 %v1902_v33  ;;  %1460 = vmatpush.msra.mxu2 %v1902_v33  ;;  %v320_v26 = vld [vmem:[%s2418_s3] sm:$0xff] }
  0xb8   :  { %v293_v43 = vmul.f32 0.5, %v1512_v39  ;;  %v260_v45 = vmul.f32 0.5, %v244_v36  ;;  %v1934_v17 = vsub.f32 %v307_v52, %v1927_v4 }
  0xb9   :  { %451 = vmatpush.msra.mxu0 %v1892_v13  ;;  %1461 = vmatpush.msra.mxu2 %v1892_v13  ;;  %v643_v46 = vand.u32 4294901760, %v1905_v41 }
  0xba   :  { %v309_v50 = vadd.f32 0.5, %v293_v43  ;;  %1513 = vtanh.f32 %v260_v45  ;;  %v1946_v43 = vand.u32 4294901760, %v320_v26  ;;  %v1948_v45 = vand.u32 4294901760, %v328_v27 }
  0xbb   :  { %v644_v57 = vsub.f32 %v1905_v41, %v643_v46 }
  0xbc   :  { %v1920_v59 = vand.u32 4294901760, %v309_v50  ;;  %v173_v60 = vpop.permute.xlu1 %172 }
  0xbd   :  { %v242_v62 = vadd.f32 %v173_v60, %v130_v53  ;;  %v53_v0 = vpop.permute.xlu0 %52  ;;  %v645_v2 = vand.u32 4294901760, %v644_v57 }
  0xbe   :  { %v1923_v3 = vsub.f32 %v309_v50, %v1920_v59  ;;  %453 = vmatpush.msra.mxu0 %v1920_v59  ;;  %1462 = vmatpush.msra.mxu2 %v1920_v59  ;;  %v129_v28 = vmul.f32 %v1728_v47, %v53_v0  ;;  %v2423_v47 = vand.u32 4294901760, %v1934_v17  ;;  %v1960_v0 = vsub.f32 %v320_v26, %v1946_v43 }
  0xbf   :  { %v258_v5 = vmul.f32 0.5, %v242_v62  ;;  %646 = vmatpush.msra.mxu1 %v645_v2  ;;  %1476 = vmatpush.msra.mxu3 %v645_v2  ;;  %v1963_v2 = vsub.f32 %v328_v27, %v1948_v45 }
  0xc0   :  { %v1514_v9 = vpop.eup %1513  ;;  %v655_v11 = vand.u32 4294901760, %v1923_v3 }
  0xc1   :  { %v292_v14 = vmul.f32 0.5, %v1514_v9  ;;  %1515 = vtanh.f32 %v258_v5  ;;  %652 = vmatpush.msra.mxu1 %v651_v7  ;;  %1477 = vmatpush.msra.mxu3 %v651_v7  ;;  %v668_v7 = vsub.f32 %v1934_v17, %v2423_v47  ;;  %v2422_v26 = vand.u32 4294901760, %v1963_v2 }
  0xc2   :  { %v656_v16 = vsub.f32 %v1923_v3, %v655_v11 }
  0xc3   :  { %v308_v23 = vadd.f32 0.5, %v292_v14  ;;  %v329_v14 = vld [vmem:[%s2418_s3 + $0x48] sm:$0xff] }
  0xc4   :  { %v163_v30 = vpop.permute.xlu1 %162  ;;  %v657_v32 = vand.u32 4294901760, %v656_v16 }
  0xc5   :  { %v1944_v35 = vand.u32 4294901760, %v308_v23  ;;  %v240_v36 = vadd.f32 %v163_v30, %v128_v19  ;;  %v168_v39 = vpop.permute.xlu0 %167  ;;  %v1986_v30 = vand.u32 4294901760, %v321_v10 }
  0xc6   :  { %v241_v40 = vadd.f32 %v168_v39, %v129_v28  ;;  %658 = vmatpush.msra.mxu1 %v657_v32  ;;  %1478 = vmatpush.msra.mxu3 %v657_v32  ;;  %v669_v28 = vand.u32 4294901760, %v668_v7  ;;  %v1988_v32 = vand.u32 4294901760, %v329_v14 }
  0xc7   :  { %v1516_v50 = vpop.eup %1515  ;;  %v1951_v52 = vsub.f32 %v308_v23, %v1944_v35  ;;  %v256_v53 = vmul.f32 0.5, %v240_v36  ;;  %455 = vmatpush.msra.mxu0 %v1944_v35  ;;  %1463 = vmatpush.msra.mxu2 %v1944_v35  ;;  %v2420_v23 = vand.u32 4294901760, %v1960_v0  ;;  %v2001_v7 = vsub.f32 %v321_v10, %v1986_v30  ;;  %v322_v10 = vld [vmem:[%s2418_s3 + $0x10] sm:$0xff] }
  0xc8   :  { %v290_v57 = vmul.f32 0.5, %v1516_v50  ;;  %v257_v58 = vmul.f32 0.5, %v241_v40 }
  0xc9   :  { %1517 = vtanh.f32 %v256_v53  ;;  %457 = vmatpush.msra.mxu0 %v1927_v4  ;;  %1464 = vmatpush.msra.mxu2 %v1927_v4  ;;  %v2424_v60 = vand.u32 4294901760, %v1951_v52 }
  0xca   :  { %v306_v62 = vadd.f32 0.5, %v290_v57  ;;  %1519 = vtanh.f32 %v257_v58  ;;  %v467_v58 = vsub.f32 %v1960_v0, %v2420_v23 }
  0xcb   :  { %v662_v5 = vsub.f32 %v1951_v52, %v2424_v60 }
  0xcc   :  { %v1971_v9 = vand.u32 4294901760, %v306_v62  ;;  %v468_v23 = vand.u32 4294901760, %v467_v58 }
  0xcd   :  { %v663_v16 = vand.u32 4294901760, %v662_v5 }
  0xce   :  { %v1980_v19 = vsub.f32 %v306_v62, %v1971_v9  ;;  %459 = vmatpush.msra.mxu0 %v1971_v9  ;;  %1465 = vmatpush.msra.mxu2 %v1971_v9  ;;  %v531_v62 = vsub.f32 %v1963_v2, %v2422_v26 }
  0xcf   :  { %v1518_v27 = vpop.eup %1517  ;;  %664 = vmatpush.msra.mxu1 %v663_v16  ;;  %1479 = vmatpush.msra.mxu3 %v663_v16  ;;  %v2004_v16 = vsub.f32 %v329_v14, %v1988_v32  ;;  %v330_v14 = vld [vmem:[%s2418_s3 + $0x50] sm:$0xff] }
  0xd0   :  { %v1520_v36 = vpop.eup %1519  ;;  %v288_v39 = vmul.f32 0.5, %v1518_v27  ;;  %v2421_v40 = vand.u32 4294901760, %v1980_v19 }
  0xd1   :  { %v289_v50 = vmul.f32 0.5, %v1520_v36  ;;  %670 = vmatpush.msra.mxu1 %v669_v28  ;;  %1480 = vmatpush.msra.mxu3 %v669_v28 }
  0xd2   :  { %v304_v53 = vadd.f32 0.5, %v288_v39  ;;  %v674_v57 = vsub.f32 %v1980_v19, %v2421_v40  ;;  %v532_v40 = vand.u32 4294901760, %v531_v62 }
  0xd3   :  { %v305_v5 = vadd.f32 0.5, %v289_v50 }
  0xd4   :  { %v2006_v27 = vand.u32 4294901760, %v304_v53  ;;  %v675_v28 = vand.u32 4294901760, %v674_v57  ;;  %v2425_v57 = vand.u32 4294901760, %v2004_v16 }
  0xd5   :  { %v2008_v36 = vand.u32 4294901760, %v305_v5 }
  0xd6   :  { %v2011_v39 = vsub.f32 %v304_v53, %v2006_v27  ;;  %676 = vmatpush.msra.mxu1 %v675_v28  ;;  %1481 = vmatpush.msra.mxu3 %v675_v28  ;;  %v2426_v53 = vand.u32 4294901760, %v2001_v7  ;;  %v2030_v28 = vand.u32 4294901760, %v322_v10  ;;  %v539_v60 = vsub.f32 %v2004_v16, %v2425_v57 }
  0xd7   :  { %v2020_v50 = vsub.f32 %v305_v5, %v2008_v36  ;;  %461 = vmatpush.msra.mxu0 %v2008_v36  ;;  %1466 = vmatpush.msra.mxu2 %v2008_v36  ;;  %v2032_v5 = vand.u32 4294901760, %v330_v14 }
  0xd8   :  { %v2427_v58 = vand.u32 4294901760, %v2011_v39  ;;  %v475_v47 = vsub.f32 %v2001_v7, %v2426_v53  ;;  %v540_v53 = vand.u32 4294901760, %v539_v60 }
  0xd9   :  { %463 = vmatpush.msra.mxu0 %v2006_v27  ;;  %1467 = vmatpush.msra.mxu2 %v2006_v27  ;;  %v679_v62 = vand.u32 4294901760, %v2020_v50 }
  0xda   :  { %469 = vmatmul.f32.vlgmr.msra.gmra.mxu0 %v468_v23  ;;  %533 = vmatmul.f32.vlgmr.msra.gmra.mxu2 %v532_v40  ;;  %v686_v23 = vsub.f32 %v2011_v39, %v2427_v58  ;;  %v2056_v40 = vsub.f32 %v330_v14, %v2032_v5  ;;  %v476_v57 = vand.u32 4294901760, %v475_v47  ;;  %v333_v14 = vld [vmem:[%s2418_s3 + $0x68] sm:$0xff] }
  0xdb   :  { %756 = vmatpush.msrb.mxu2 %v1776_v25  ;;  %1015 = vmatpush.msrb.mxu0 %v595_v31  ;;  %v680_v26 = vsub.f32 %v2020_v50, %v679_v62  ;;  %v2053_v31 = vsub.f32 %v322_v10, %v2030_v28 }
  0xdc   :  { %v687_v58 = vand.u32 4294901760, %v686_v23  ;;  %v334_v23 = vld [vmem:[%s2418_s3 + $0x70] sm:$0xff] }
  0xdd   :  { %759 = vmatpush.msrb.mxu2 %v1799_v48  ;;  %1019 = vmatpush.msrb.mxu0 %v601_v51  ;;  %v681_v25 = vand.u32 4294901760, %v680_v26  ;;  %v323_v48 = vld [vmem:[%s2418_s3 + $0x18] sm:$0xff] }
  0xde   :  { %v331_v51 = vld [vmem:[%s2418_s3 + $0x58] sm:$0xff]  ;;  %v2072_v47 = vand.u32 4294901760, %v323_v48 }
  0xdf   :  { %762 = vmatpush.msrb.mxu2 %v1813_v63  ;;  %1023 = vmatpush.msrb.mxu0 %v607_v8  ;;  %v482_v63 = vand.u32 4294901760, %v2053_v31  ;;  %v546_v8 = vand.u32 4294901760, %v2056_v40  ;;  %v2074_v60 = vand.u32 4294901760, %v331_v51 }
  0xe0   :  { %682 = vmatpush.msra.mxu1 %v681_v25  ;;  %1482 = vmatpush.msra.mxu3 %v681_v25  ;;  %v2092_v26 = vsub.f32 %v323_v48, %v2072_v47 }
  0xe1   :  { %765 = vmatpush.msrb.mxu2 %v1802_v49  ;;  %1027 = vmatpush.msrb.mxu0 %v613_v1  ;;  %v483_v49 = vsub.f32 %v2053_v31, %v482_v63  ;;  %v547_v1 = vsub.f32 %v2056_v40, %v546_v8  ;;  %v2095_v10 = vsub.f32 %v331_v51, %v2074_v60 }
  0xe2   :  { %688 = vmatpush.msra.mxu1 %v687_v58  ;;  %1483 = vmatpush.msra.mxu3 %v687_v58  ;;  %v326_v58 = vld [vmem:[%s2418_s3 + $0x30] sm:$0xff] }
  0xe3   :  { %477 = vmatmul.f32.gmra.mxu0 %v476_v57  ;;  %541 = vmatmul.f32.gmra.mxu2 %v540_v53  ;;  %v2428_v53 = vand.u32 4294901760, %v1951_v52  ;;  %v2166_v57 = vand.u32 4294901760, %v333_v14  ;;  %v2201_v51 = vand.u32 4294901760, %v326_v58 }
  0xe4   :  { %690 = vmatmul.f32.vlgmr.msra.gmra.mxu1 %v1946_v43  ;;  %722 = vmatmul.f32.vlgmr.msra.gmra.mxu3 %v1948_v45 }
  0xe5   :  { %768 = vmatpush.msrb.mxu2 %v1840_v21  ;;  %884 = vmatpush.msrb.mxu3 %v1762_v20  ;;  %v548_v21 = vand.u32 4294901760, %v547_v1  ;;  %v335_v1 = vld [vmem:[%s2418_s3 + $0x78] sm:$0xff] }
  0xe6   :  { %1031 = vmatpush.msrb.mxu0 %v619_v29  ;;  %1142 = vmatpush.msrb.mxu1 %v1762_v20  ;;  %v484_v20 = vand.u32 4294901760, %v483_v49  ;;  %v324_v29 = vld [vmem:[%s2418_s3 + $0x20] sm:$0xff]  ;;  %v2207_v49 = vand.u32 4294901760, %v334_v23 }
  0xe7   :  { %771 = vmatpush.msrb.mxu2 %v1867_v54  ;;  %886 = vmatpush.msrb.mxu3 %v1785_v38  ;;  %v332_v54 = vld [vmem:[%s2418_s3 + $0x60] sm:$0xff] }
  0xe8   :  { %1035 = vmatpush.msrb.mxu0 %v625_v61  ;;  %1144 = vmatpush.msrb.mxu1 %v1785_v38  ;;  %v490_v38 = vand.u32 4294901760, %v2092_v26  ;;  %v554_v61 = vand.u32 4294901760, %v2095_v10 }
  0xe9   :  { %774 = vmatpush.msrb.mxu2 %v1860_v34  ;;  %888 = vmatpush.msrb.mxu3 %v1807_v56  ;;  %v2120_v34 = vand.u32 4294901760, %v332_v54 }
  0xea   :  { %1039 = vmatpush.msrb.mxu0 %v631_v55  ;;  %1146 = vmatpush.msrb.mxu1 %v1807_v56  ;;  %v2118_v56 = vand.u32 4294901760, %v324_v29  ;;  %v491_v55 = vsub.f32 %v2092_v26, %v490_v38 }
  0xeb   :  { %777 = vmatpush.msrb.mxu2 %v1888_v12  ;;  %890 = vmatpush.msrb.mxu3 %v1783_v37 }
  0xec   :  { %1043 = vmatpush.msrb.mxu0 %v637_v18  ;;  %1148 = vmatpush.msrb.mxu1 %v1783_v37  ;;  %v555_v37 = vsub.f32 %v2095_v10, %v554_v61  ;;  %v2138_v12 = vsub.f32 %v324_v29, %v2118_v56  ;;  %v2141_v18 = vsub.f32 %v332_v54, %v2120_v34 }
  0xed   :  { %485 = vmatmul.f32.gmra.mxu0 %v484_v20  ;;  %549 = vmatmul.f32.gmra.mxu2 %v548_v21 }
  0xee   :  { %694 = vmatmul.f32.gmra.mxu1 %v1986_v30  ;;  %726 = vmatmul.f32.gmra.mxu3 %v1988_v32 }
  0xef   :  { %780 = vmatpush.msrb.mxu2 %v1905_v41  ;;  %892 = vmatpush.msrb.mxu3 %v1837_v15  ;;  %v325_v41 = vld [vmem:[%s2418_s3 + $0x28] sm:$0xff] }
  0xf0   :  { %1047 = vmatpush.msrb.mxu0 %v643_v46  ;;  %1150 = vmatpush.msrb.mxu1 %v1837_v15  ;;  %v492_v15 = vand.u32 4294901760, %v491_v55  ;;  %v556_v46 = vand.u32 4294901760, %v555_v37 }
  0xf1   :  { %783 = vmatpush.msrb.mxu2 %v1899_v24  ;;  %894 = vmatpush.msrb.mxu3 %v1864_v44  ;;  %v562_v24 = vand.u32 4294901760, %v2141_v18 }
  0xf2   :  { %1051 = vmatpush.msrb.mxu0 %v649_v42  ;;  %1152 = vmatpush.msrb.mxu1 %v1864_v44  ;;  %v498_v44 = vand.u32 4294901760, %v2138_v12  ;;  %v2161_v42 = vand.u32 4294901760, %v325_v41 }
  0xf3   :  { %786 = vmatpush.msrb.mxu2 %v1923_v3  ;;  %896 = vmatpush.msrb.mxu3 %v1844_v22 }
  0xf4   :  { %1055 = vmatpush.msrb.mxu0 %v655_v11  ;;  %1154 = vmatpush.msrb.mxu1 %v1844_v22  ;;  %v499_v22 = vsub.f32 %v2138_v12, %v498_v44  ;;  %v2179_v3 = vsub.f32 %v325_v41, %v2161_v42  ;;  %v2429_v11 = vand.u32 4294901760, %v1934_v17 }
  0xf5   :  { %789 = vmatpush.msrb.mxu2 %v1951_v52  ;;  %898 = vmatpush.msrb.mxu3 %v1885_v6  ;;  %v2185_v52 = vsub.f32 %v333_v14, %v2166_v57 }
  0xf6   :  { %1059 = vmatpush.msrb.mxu0 %v2428_v53  ;;  %1156 = vmatpush.msrb.mxu1 %v1885_v6  ;;  %v563_v6 = vsub.f32 %v2141_v18, %v562_v24  ;;  %v506_v48 = vand.u32 4294901760, %v2179_v3 }
  0xf7   :  { %493 = vmatmul.f32.gmra.mxu0 %v492_v15  ;;  %557 = vmatmul.f32.gmra.mxu2 %v556_v46 }
  0xf8   :  { %698 = vmatmul.f32.gmra.mxu1 %v2030_v28  ;;  %730 = vmatmul.f32.gmra.mxu3 %v2032_v5  ;;  %v564_v25 = vand.u32 4294901760, %v563_v6 }
  0xf9   :  { %792 = vmatpush.msrb.mxu2 %v1934_v17  ;;  %900 = vmatpush.msrb.mxu3 %v1902_v33  ;;  %v2430_v17 = vand.u32 4294901760, %v1980_v19 }
  0xfa   :  { %1063 = vmatpush.msrb.mxu0 %v2429_v11  ;;  %1158 = vmatpush.msrb.mxu1 %v1902_v33  ;;  %v500_v33 = vand.u32 4294901760, %v499_v22 }
  0xfb   :  { %795 = vmatpush.msrb.mxu2 %v1980_v19  ;;  %902 = vmatpush.msrb.mxu3 %v1892_v13  ;;  %v570_v19 = vand.u32 4294901760, %v2185_v52 }
  0xfc   :  { %1067 = vmatpush.msrb.mxu0 %v2430_v17  ;;  %1160 = vmatpush.msrb.mxu1 %v1892_v13  ;;  %v2431_v13 = vand.u32 4294901760, %v2011_v39 }
  0xfd   :  { %798 = vmatpush.msrb.mxu2 %v2020_v50  ;;  %904 = vmatpush.msrb.mxu3 %v1920_v59  ;;  %v507_v50 = vsub.f32 %v2179_v3, %v506_v48 }
  0xfe   :  { %1071 = vmatpush.msrb.mxu0 %v679_v62  ;;  %1162 = vmatpush.msrb.mxu1 %v1920_v59  ;;  %v2218_v59 = vsub.f32 %v326_v58, %v2201_v51  ;;  %v2226_v62 = vsub.f32 %v334_v23, %v2207_v49  ;;  %v2432_v58 = vand.u32 4294901760, %v1960_v0  ;;  %v2433_v23 = vand.u32 4294901760, %v2001_v7 }
  0xff   :  { %801 = vmatpush.msrb.mxu2 %v2011_v39  ;;  %906 = vmatpush.msrb.mxu3 %v1944_v35  ;;  %v571_v39 = vsub.f32 %v2185_v52, %v570_v19  ;;  %v508_v20 = vand.u32 4294901760, %v507_v50 }
 0x100   :  { %1075 = vmatpush.msrb.mxu0 %v2431_v13  ;;  %1164 = vmatpush.msrb.mxu1 %v1944_v35  ;;  %v327_v35 = vld [vmem:[%s2418_s3 + $0x38] sm:$0xff]  ;;  %v514_v21 = vand.u32 4294901760, %v2218_v59  ;;  %v578_v54 = vand.u32 4294901760, %v2226_v62  ;;  %v2434_v13 = vand.u32 4294901760, %v1963_v2 }
 0x101   :  { %501 = vmatmul.f32.gmra.mxu0 %v500_v33  ;;  %565 = vmatmul.f32.gmra.mxu2 %v564_v25  ;;  %v572_v29 = vand.u32 4294901760, %v571_v39  ;;  %v2240_v55 = vand.u32 4294901760, %v327_v35 }
 0x102   :  { %702 = vmatmul.f32.gmra.mxu1 %v2072_v47  ;;  %734 = vmatmul.f32.gmra.mxu3 %v2074_v60  ;;  %v579_v37 = vsub.f32 %v2226_v62, %v578_v54 }
 0x103   :  { %908 = vmatpush.msrb.mxu3 %v1927_v4  ;;  %1166 = vmatpush.msrb.mxu1 %v1927_v4  ;;  %v2242_v4 = vand.u32 4294901760, %v335_v1  ;;  %v2255_v41 = vsub.f32 %v327_v35, %v2240_v55 }
 0x105   :  { %910 = vmatpush.msrb.mxu3 %v1971_v9  ;;  %1168 = vmatpush.msrb.mxu1 %v1971_v9  ;;  %v515_v9 = vsub.f32 %v2218_v59, %v514_v21  ;;  %v2258_v15 = vsub.f32 %v335_v1, %v2242_v4  ;;  %v522_v46 = vand.u32 4294901760, %v2255_v41 }
 0x107   :  { %912 = vmatpush.msrb.mxu3 %v2008_v36  ;;  %1170 = vmatpush.msrb.mxu1 %v2008_v36  ;;  %v580_v36 = vand.u32 4294901760, %v579_v37  ;;  %v586_v14 = vand.u32 4294901760, %v2258_v15  ;;  %v523_v53 = vsub.f32 %v2255_v41, %v522_v46 }
 0x109   :  { %914 = vmatpush.msrb.mxu3 %v2006_v27  ;;  %1172 = vmatpush.msrb.mxu1 %v2006_v27  ;;  %v516_v27 = vand.u32 4294901760, %v515_v9  ;;  %v587_v22 = vsub.f32 %v2258_v15, %v586_v14  ;;  %v524_v6 = vand.u32 4294901760, %v523_v53 }
 0x10a   :  { %509 = vmatmul.f32.gmra.mxu0 %v508_v20  ;;  %573 = vmatmul.f32.gmra.mxu2 %v572_v29 }
 0x10b   :  { %706 = vmatmul.f32.gmra.mxu1 %v2118_v56  ;;  %738 = vmatmul.f32.gmra.mxu3 %v2120_v34  ;;  %v588_v11 = vand.u32 4294901760, %v587_v22 }
 0x112   :  { %517 = vmatmul.f32.gmra.mxu0 %v516_v27  ;;  %581 = vmatmul.f32.gmra.mxu2 %v580_v36 }
 0x113   :  { %710 = vmatmul.f32.gmra.mxu1 %v2161_v42  ;;  %742 = vmatmul.f32.gmra.mxu3 %v2166_v57 }
 0x11a   :  { %525 = vmatmul.f32.gmra.mxu0 %v524_v6  ;;  %589 = vmatmul.f32.gmra.mxu2 %v588_v11 }
 0x11b   :  { %714 = vmatmul.f32.gmra.mxu1 %v2201_v51  ;;  %746 = vmatmul.f32.gmra.mxu3 %v2207_v49 }
 0x122   :  { %804 = vmatmul.f32.vlgmr.msrb.gmra.mxu2 %v1960_v0  ;;  %1077 = vmatmul.f32.vlgmr.msrb.gmra.mxu0 %v1946_v43  ;;  %v365_v0 = vpop.permute.xlu1 %364 }
 0x123   :  { %718 = vmatmul.f32.gmra.mxu1 %v2240_v55  ;;  %750 = vmatmul.f32.gmra.mxu3 %v2242_v4 }
 0x12a   :  { %809 = vmatmul.f32.gmra.mxu2 %v2001_v7  ;;  %1081 = vmatmul.f32.gmra.mxu0 %v1986_v30 }
 0x12b   :  { %918 = vmatmul.f32.vlgmr.msrb.gmra.mxu3 %v2432_v58  ;;  %1174 = vmatmul.f32.vlgmr.msrb.gmra.mxu1 %v1946_v43  ;;  %v355_v43 = vpop.permute.xlu2 %354 }
 0x132   :  { %814 = vmatmul.f32.gmra.mxu2 %v2053_v31  ;;  %1085 = vmatmul.f32.gmra.mxu0 %v2030_v28  ;;  %v2308_v31 = vpop.permute.xlu1 %379 }
 0x133   :  { %924 = vmatmul.f32.gmra.mxu3 %v2433_v23  ;;  %1178 = vmatmul.f32.gmra.mxu1 %v1986_v30  ;;  %v370_v7 = vpop.permute.xlu2 %369 }
 0x13a   :  { %819 = vmatmul.f32.gmra.mxu2 %v2092_v26  ;;  %1089 = vmatmul.f32.gmra.mxu0 %v2072_v47 }
 0x13b   :  { %930 = vmatmul.f32.gmra.mxu3 %v482_v63  ;;  %1182 = vmatmul.f32.gmra.mxu1 %v2030_v28  ;;  %v360_v28 = vpop.permute.xlu0 %359 }
 0x142   :  { %824 = vmatmul.f32.gmra.mxu2 %v2138_v12  ;;  %1093 = vmatmul.f32.gmra.mxu0 %v2118_v56  ;;  %v2318_v12 = vpop.permute.xlu2 %384 }
 0x143   :  { %936 = vmatmul.f32.gmra.mxu3 %v490_v38  ;;  %1186 = vmatmul.f32.gmra.mxu1 %v2072_v47 }
 0x14a   :  { %829 = vmatmul.f32.gmra.mxu2 %v2179_v3  ;;  %1097 = vmatmul.f32.gmra.mxu0 %v2161_v42  ;;  %v400_v39 = vpop.permute.xlu2 %399 }
 0x14b   :  { %942 = vmatmul.f32.gmra.mxu3 %v498_v44  ;;  %1190 = vmatmul.f32.gmra.mxu1 %v2118_v56  ;;  %v375_v44 = vpop.permute.xlu0 %374 }
 0x152   :  { %834 = vmatmul.f32.gmra.mxu2 %v2218_v59  ;;  %1101 = vmatmul.f32.gmra.mxu0 %v2201_v51 }
 0x153   :  { %948 = vmatmul.f32.gmra.mxu3 %v506_v48  ;;  %1194 = vmatmul.f32.gmra.mxu1 %v2161_v42  ;;  %v395_v42 = vpop.permute.xlu1 %394  ;;  %v2329_v35 = vpop.permute.xlu0 %389 }
 0x157   :  { %v470_v30 = vpop.f32.mrf.mxu0 }
 0x158   :  { %v471_v47 = vadd.f32 %v470_v30, %v355_v43 }
 0x15a   :  { %839 = vmatmul.f32.gmra.mxu2 %v2255_v41  ;;  %1105 = vmatmul.f32.gmra.mxu0 %v2240_v55 }
 0x15b   :  { %954 = vmatmul.f32.gmra.mxu3 %v514_v21  ;;  %1198 = vmatmul.f32.gmra.mxu1 %v2201_v51  ;;  %v405_v41 = vpop.permute.xlu0 %404  ;;  %v410_v11 = vpop.permute.xlu1 %409 }
 0x15d   :  { %v534_v63 = vpop.f32.mrf.mxu2 }
 0x15e   :  { %v535_v3 = vadd.f32 %v534_v63, %v395_v42 }
 0x160   :  { %v478_v26 = vpop.f32.mrf.mxu0 }
 0x161   :  { %v691_v38 = vpop.f32.mrf.mxu1  ;;  %v479_v48 = vadd.f32 %v478_v26, %v360_v28 }
 0x162   :  { %844 = vmatmul.f32.gmra.mxu2 %v1963_v2  ;;  %v2314_v56 = vadd.f32 %v691_v38, %v471_v47  ;;  %1109 = vmatmul.f32.gmra.mxu0 %v1948_v45  ;;  %v2435_v2 = vand.u32 4294901760, %v2004_v16 }
 0x163   :  { %960 = vmatmul.f32.gmra.mxu3 %v522_v46  ;;  %1202 = vmatmul.f32.gmra.mxu1 %v2240_v55 }
 0x166   :  { %v542_v17 = vpop.f32.mrf.mxu2 }
 0x167   :  { %v723_v33 = vpop.f32.mrf.mxu3  ;;  %v543_v1 = vadd.f32 %v542_v17, %v400_v39 }
 0x168   :  { %v2320_v25 = vadd.f32 %v723_v33, %v535_v3 }
 0x16a   :  { %849 = vmatmul.f32.gmra.mxu2 %v2004_v16  ;;  %v486_v51 = vpop.f32.mrf.mxu0  ;;  %1113 = vmatmul.f32.gmra.mxu0 %v1988_v32 }
 0x16b   :  { %966 = vmatmul.f32.gmra.mxu3 %v2434_v13  ;;  %v695_v50 = vpop.f32.mrf.mxu1  ;;  %1206 = vmatmul.f32.gmra.mxu1 %v1948_v45  ;;  %v487_v45 = vadd.f32 %v486_v51, %v365_v0 }
 0x16c   :  { %v2327_v59 = vadd.f32 %v695_v50, %v479_v48 }
 0x170   :  { %v550_v20 = vpop.f32.mrf.mxu2 }
 0x171   :  { %v727_v21 = vpop.f32.mrf.mxu3  ;;  %v551_v27 = vadd.f32 %v550_v20, %v405_v41 }
 0x172   :  { %854 = vmatmul.f32.gmra.mxu2 %v2056_v40  ;;  %v2332_v29 = vadd.f32 %v727_v21, %v543_v1  ;;  %1117 = vmatmul.f32.gmra.mxu0 %v2032_v5 }
 0x173   :  { %972 = vmatmul.f32.gmra.mxu3 %v2435_v2  ;;  %1210 = vmatmul.f32.gmra.mxu1 %v1988_v32 }
 0x174   :  { %v494_v55 = vpop.f32.mrf.mxu0 }
 0x175   :  { %v699_v9 = vpop.f32.mrf.mxu1  ;;  %v495_v32 = vadd.f32 %v494_v55, %v370_v7 }
 0x176   :  { %v2338_v37 = vadd.f32 %v699_v9, %v487_v45 }
 0x17a   :  { %859 = vmatmul.f32.gmra.mxu2 %v2095_v10  ;;  %v558_v36 = vpop.f32.mrf.mxu2  ;;  %1121 = vmatmul.f32.gmra.mxu0 %v2074_v60 }
 0x17b   :  { %978 = vmatmul.f32.gmra.mxu3 %v546_v8  ;;  %v731_v46 = vpop.f32.mrf.mxu3  ;;  %1214 = vmatmul.f32.gmra.mxu1 %v2032_v5  ;;  %v559_v40 = vadd.f32 %v558_v36, %v410_v11 }
 0x17c   :  { %v2345_v16 = vadd.f32 %v731_v46, %v551_v27 }
 0x17e   :  { %v502_v53 = vpop.f32.mrf.mxu0 }
 0x17f   :  { %v703_v22 = vpop.f32.mrf.mxu1  ;;  %v503_v23 = vadd.f32 %v502_v53, %v375_v44 }
 0x180   :  { %v2347_v6 = vadd.f32 %v703_v22, %v495_v32 }
 0x182   :  { %864 = vmatmul.f32.gmra.mxu2 %v2141_v18  ;;  %1125 = vmatmul.f32.gmra.mxu0 %v2120_v34 }
 0x183   :  { %984 = vmatmul.f32.gmra.mxu3 %v554_v61  ;;  %1218 = vmatmul.f32.gmra.mxu1 %v2074_v60  ;;  %v415_v60 = vpop.permute.xlu2 %414 }
 0x184   :  { %v566_v8 = vpop.f32.mrf.mxu2 }
 0x185   :  { %v735_v5 = vpop.f32.mrf.mxu3  ;;  %v567_v10 = vadd.f32 %v566_v8, %v415_v60 }
 0x186   :  { %v2354_v58 = vadd.f32 %v735_v5, %v559_v40 }
 0x187   :  { %v510_v43 = vpop.f32.mrf.mxu0 }
 0x188   :  { %v707_v0 = vpop.f32.mrf.mxu1  ;;  %v511_v28 = vadd.f32 %v510_v43, %v2308_v31 }
 0x189   :  { %v2356_v30 = vadd.f32 %v707_v0, %v503_v23 }
 0x18a   :  { %869 = vmatmul.f32.gmra.mxu2 %v2185_v52  ;;  %1129 = vmatmul.f32.gmra.mxu0 %v2166_v57 }
 0x18b   :  { %990 = vmatmul.f32.gmra.mxu3 %v562_v24  ;;  %1222 = vmatmul.f32.gmra.mxu1 %v2120_v34  ;;  %v420_v34 = vpop.permute.xlu0 %419 }
 0x18d   :  { %v574_v61 = vpop.f32.mrf.mxu2 }
 0x18e   :  { %v739_v7 = vpop.f32.mrf.mxu3  ;;  %v575_v18 = vadd.f32 %v574_v61, %v420_v34 }
 0x18f   :  { %v2364_v63 = vadd.f32 %v739_v7, %v567_v10  ;;  %v518_v47 = vpop.f32.mrf.mxu0 }
 0x190   :  { %v711_v26 = vpop.f32.mrf.mxu1  ;;  %v519_v31 = vadd.f32 %v518_v47, %v2318_v12 }
 0x191   :  { %v2366_v38 = vadd.f32 %v711_v26, %v511_v28 }
 0x192   :  { %874 = vmatmul.f32.gmra.mxu2 %v2226_v62  ;;  %1133 = vmatmul.f32.gmra.mxu0 %v2207_v49  ;;  %v430_v62 = vpop.permute.xlu2 %429 }
 0x193   :  { %996 = vmatmul.f32.gmra.mxu3 %v570_v19  ;;  %1226 = vmatmul.f32.gmra.mxu1 %v2166_v57  ;;  %v425_v57 = vpop.permute.xlu1 %424 }
 0x195   :  { %v582_v24 = vpop.f32.mrf.mxu2 }
 0x196   :  { %v743_v44 = vpop.f32.mrf.mxu3  ;;  %v583_v52 = vadd.f32 %v582_v24, %v425_v57 }
 0x197   :  { %v2374_v42 = vadd.f32 %v743_v44, %v575_v18  ;;  %v526_v3 = vpop.f32.mrf.mxu0 }
 0x198   :  { %v715_v17 = vpop.f32.mrf.mxu1  ;;  %v527_v12 = vadd.f32 %v526_v3, %v2329_v35 }
 0x199   :  { %v2376_v33 = vadd.f32 %v715_v17, %v519_v31 }
 0x19a   :  { %879 = vmatmul.f32.gmra.mxu2 %v2258_v15  ;;  %1137 = vmatmul.f32.gmra.mxu0 %v2242_v4 }
 0x19b   :  { %1002 = vmatmul.f32.gmra.mxu3 %v578_v54  ;;  %1230 = vmatmul.f32.gmra.mxu1 %v2207_v49 }
 0x19d   :  { %v590_v19 = vpop.f32.mrf.mxu2 }
 0x19e   :  { %v747_v48 = vpop.f32.mrf.mxu3  ;;  %v591_v54 = vadd.f32 %v590_v19, %v430_v62  ;;  %v1321_v19 = vpop.permute.xlu0 %1320 }
 0x19f   :  { %v2384_v51 = vadd.f32 %v747_v48, %v583_v52  ;;  %v1078_v13 = vpop.f32.mrf.mxu0  ;;  %v1326_v52 = vpop.permute.xlu1 %1325 }
 0x1a0   :  { %v719_v50 = vpop.f32.mrf.mxu1 }
 0x1a1   :  { %v2386_v39 = vadd.f32 %v719_v50, %v527_v12 }
 0x1a3   :  { %1008 = vmatmul.f32.gmra.mxu3 %v586_v14  ;;  %1234 = vmatmul.f32.gmra.mxu1 %v2242_v4 }
 0x1a5   :  { %v805_v49 = vpop.f32.mrf.mxu2 }
 0x1a6   :  { %v751_v1 = vpop.f32.mrf.mxu3  ;;  %v806_v20 = vadd.f32 %v805_v49, %v2314_v56 }
 0x1a7   :  { %v2392_v21 = vadd.f32 %v751_v1, %v591_v54  ;;  %v1082_v35 = vpop.f32.mrf.mxu0 }
 0x1a8   :  { %v1175_v2 = vpop.f32.mrf.mxu1 }
 0x1ad   :  { %v810_v45 = vpop.f32.mrf.mxu2 }
 0x1ae   :  { %v811_v55 = vadd.f32 %v810_v45, %v2327_v59  ;;  %v919_v9 = vpop.f32.mrf.mxu3 }
 0x1af   :  { %v920_v41 = vadd.f32 %v919_v9, %v806_v20  ;;  %v1086_v27 = vpop.f32.mrf.mxu0  ;;  %v1331_v9 = vpop.permute.xlu2 %1330 }
 0x1b0   :  { %v1179_v15 = vpop.f32.mrf.mxu1 }
 0x1b1   :  { %v1079_v14 = vadd.f32 %v1078_v13, %v920_v41 }
 0x1b3   :  { %v1176_v36 = vadd.f32 %v1175_v2, %v1079_v14 }
 0x1b5   :  { %v1238_v4 = vmul.f32 0.5, %v1176_v36  ;;  %v815_v46 = vpop.f32.mrf.mxu2 }
 0x1b6   :  { %v816_v32 = vadd.f32 %v815_v46, %v2338_v37  ;;  %v925_v53 = vpop.f32.mrf.mxu3 }
 0x1b7   :  { %v926_v22 = vadd.f32 %v925_v53, %v811_v55  ;;  %v1090_v56 = vpop.f32.mrf.mxu0  ;;  %1521 = vtanh.f32 %v1238_v4 }
 0x1b8   :  { %v1183_v11 = vpop.f32.mrf.mxu1 }
 0x1b9   :  { %v1083_v40 = vadd.f32 %v1082_v35, %v926_v22 }
 0x1bb   :  { %v1180_v8 = vadd.f32 %v1179_v15, %v1083_v40 }
 0x1bd   :  { %v1239_v5 = vmul.f32 0.5, %v1180_v8  ;;  %v820_v23 = vpop.f32.mrf.mxu2  ;;  %v1522_v0 = vpop.eup %1521 }
 0x1be   :  { %v821_v59 = vadd.f32 %v820_v23, %v2347_v6  ;;  %v931_v43 = vpop.f32.mrf.mxu3  ;;  %v1270_v28 = vmul.f32 0.5, %v1522_v0 }
 0x1bf   :  { %1523 = vtanh.f32 %v1239_v5  ;;  %v932_v60 = vadd.f32 %v931_v43, %v816_v32  ;;  %v1094_v10 = vpop.f32.mrf.mxu0  ;;  %v1336_v5 = vpop.permute.xlu0 %1335 }
 0x1c0   :  { %v1187_v61 = vpop.f32.mrf.mxu1  ;;  %v1286_v18 = vadd.f32 0.5, %v1270_v28 }
 0x1c1   :  { %v1087_v7 = vadd.f32 %v1086_v27, %v932_v60 }
 0x1c2   :  { %v1398_v12 = vmul.f32 %v1321_v19, %v1286_v18  ;;  %v1341_v18 = vpop.permute.xlu1 %1340 }
 0x1c3   :  { %v1184_v37 = vadd.f32 %v1183_v11, %v1087_v7 }
 0x1c5   :  { %v1524_v47 = vpop.eup %1523  ;;  %v1240_v26 = vmul.f32 0.5, %v1184_v37  ;;  %v825_v34 = vpop.f32.mrf.mxu2 }
 0x1c6   :  { %v1271_v24 = vmul.f32 0.5, %v1524_v47  ;;  %v826_v44 = vadd.f32 %v825_v34, %v2356_v30  ;;  %v937_v31 = vpop.f32.mrf.mxu3 }
 0x1c7   :  { %1525 = vtanh.f32 %v1240_v26  ;;  %v938_v3 = vadd.f32 %v937_v31, %v821_v59  ;;  %v1098_v6 = vpop.f32.mrf.mxu0 }
 0x1c8   :  { %v1287_v17 = vadd.f32 0.5, %v1271_v24  ;;  %v1191_v57 = vpop.f32.mrf.mxu1 }
 0x1c9   :  { %v1091_v48 = vadd.f32 %v1090_v56, %v938_v3 }
 0x1ca   :  { %v1399_v13 = vmul.f32 %v1326_v52, %v1287_v17 }
 0x1cb   :  { %v1188_v50 = vadd.f32 %v1187_v61, %v1091_v48 }
 0x1cc   :  { %v1414_v62 = vadd.f32 %v1399_v13, %v1398_v12 }
 0x1cd   :  { %v1526_v54 = vpop.eup %1525  ;;  %v1241_v49 = vmul.f32 0.5, %v1188_v50  ;;  %v830_v1 = vpop.f32.mrf.mxu2 }
 0x1ce   :  { %v1272_v20 = vmul.f32 0.5, %v1526_v54  ;;  %v943_v35 = vpop.f32.mrf.mxu3  ;;  %v831_v4 = vadd.f32 %v830_v1, %v2366_v38  ;;  %v1346_v50 = vpop.permute.xlu2 %1345 }
 0x1cf   :  { %1527 = vtanh.f32 %v1241_v49  ;;  %v944_v30 = vadd.f32 %v943_v35, %v826_v44  ;;  %v1102_v2 = vpop.f32.mrf.mxu0 }
 0x1d0   :  { %v1288_v45 = vadd.f32 0.5, %v1272_v20  ;;  %v1195_v55 = vpop.f32.mrf.mxu1 }
 0x1d1   :  { %v1095_v41 = vadd.f32 %v1094_v10, %v944_v30 }
 0x1d2   :  { %v1400_v27 = vmul.f32 %v1331_v9, %v1288_v45 }
 0x1d3   :  { %v1192_v15 = vadd.f32 %v1191_v57, %v1095_v41 }
 0x1d4   :  { %v1415_v14 = vadd.f32 %v1414_v62, %v1400_v27 }
 0x1d5   :  { %v1528_v36 = vpop.eup %1527  ;;  %v1242_v46 = vmul.f32 0.5, %v1192_v15  ;;  %v835_v32 = vpop.f32.mrf.mxu2 }
 0x1d6   :  { %v1273_v53 = vmul.f32 0.5, %v1528_v36  ;;  %v949_v22 = vpop.f32.mrf.mxu3  ;;  %v836_v10 = vadd.f32 %v835_v32, %v2376_v33  ;;  %v1351_v15 = vpop.permute.xlu0 %1350 }
 0x1d7   :  { %1529 = vtanh.f32 %v1242_v46  ;;  %v950_v56 = vadd.f32 %v949_v22, %v831_v4  ;;  %v1106_v11 = vpop.f32.mrf.mxu0 }
 0x1d8   :  { %v1289_v40 = vadd.f32 0.5, %v1273_v53  ;;  %v1199_v8 = vpop.f32.mrf.mxu1 }
 0x1d9   :  { %v1099_v23 = vadd.f32 %v1098_v6, %v950_v56 }
 0x1da   :  { %v1401_v59 = vmul.f32 %v1336_v5, %v1289_v40 }
 0x1db   :  { %v1196_v43 = vadd.f32 %v1195_v55, %v1099_v23 }
 0x1dc   :  { %v1416_v0 = vadd.f32 %v1415_v14, %v1401_v59  ;;  %v1356_v59 = vpop.permute.xlu1 %1355 }
 0x1dd   :  { %v1530_v60 = vpop.eup %1529  ;;  %v1243_v61 = vmul.f32 0.5, %v1196_v43  ;;  %v840_v7 = vpop.f32.mrf.mxu2 }
 0x1de   :  { %v1274_v38 = vmul.f32 0.5, %v1530_v60  ;;  %v955_v28 = vpop.f32.mrf.mxu3  ;;  %v841_v17 = vadd.f32 %v840_v7, %v2386_v39 }
 0x1df   :  { %1531 = vtanh.f32 %v1243_v61  ;;  %v956_v37 = vadd.f32 %v955_v28, %v836_v10  ;;  %v1110_v34 = vpop.f32.mrf.mxu0 }
 0x1e0   :  { %v1290_v47 = vadd.f32 0.5, %v1274_v38  ;;  %v1203_v26 = vpop.f32.mrf.mxu1 }
 0x1e1   :  { %v1103_v24 = vadd.f32 %v1102_v2, %v956_v37 }
 0x1e2   :  { %v1402_v44 = vmul.f32 %v1341_v18, %v1290_v47 }
 0x1e3   :  { %v1200_v31 = vadd.f32 %v1199_v8, %v1103_v24  ;;  %v1361_v24 = vpop.permute.xlu2 %1360 }
 0x1e4   :  { %v1417_v3 = vadd.f32 %v1416_v0, %v1402_v44 }
 0x1e5   :  { %v1532_v6 = vpop.eup %1531  ;;  %v1244_v57 = vmul.f32 0.5, %v1200_v31  ;;  %v845_v52 = vpop.f32.mrf.mxu2 }
 0x1e6   :  { %v1275_v33 = vmul.f32 0.5, %v1532_v6  ;;  %v961_v19 = vpop.f32.mrf.mxu3  ;;  %v846_v30 = vadd.f32 %v845_v52, %v2320_v25 }
 0x1e7   :  { %1533 = vtanh.f32 %v1244_v57  ;;  %v962_v48 = vadd.f32 %v961_v19, %v841_v17  ;;  %v1114_v49 = vpop.f32.mrf.mxu0 }
 0x1e8   :  { %v1291_v12 = vadd.f32 0.5, %v1275_v33  ;;  %v1207_v13 = vpop.f32.mrf.mxu1 }
 0x1e9   :  { %v1107_v62 = vadd.f32 %v1106_v11, %v962_v48 }
 0x1ea   :  { %v1403_v54 = vmul.f32 %v1346_v50, %v1291_v12  ;;  %v1366_v50 = vpop.permute.xlu0 %1365 }
 0x1eb   :  { %v1204_v1 = vadd.f32 %v1203_v26, %v1107_v62 }
 0x1ec   :  { %v1418_v20 = vadd.f32 %v1417_v3, %v1403_v54 }
 0x1ed   :  { %v1534_v35 = vpop.eup %1533  ;;  %v1245_v2 = vmul.f32 0.5, %v1204_v1  ;;  %v850_v45 = vpop.f32.mrf.mxu2 }
 0x1ee   :  { %v1276_v39 = vmul.f32 0.5, %v1534_v35  ;;  %v967_v55 = vpop.f32.mrf.mxu3  ;;  %v851_v22 = vadd.f32 %v850_v45, %v2332_v29 }
 0x1ef   :  { %1535 = vtanh.f32 %v1245_v2  ;;  %v968_v9 = vadd.f32 %v967_v55, %v846_v30  ;;  %v1118_v32 = vpop.f32.mrf.mxu0 }
 0x1f0   :  { %v1292_v41 = vadd.f32 0.5, %v1276_v39  ;;  %v1211_v27 = vpop.f32.mrf.mxu1 }
 0x1f1   :  { %v1111_v14 = vadd.f32 %v1110_v34, %v968_v9 }
 0x1f2   :  { %v1404_v36 = vmul.f32 %v1351_v15, %v1292_v41  ;;  %v1371_v41 = vpop.permute.xlu1 %1370 }
 0x1f3   :  { %v1208_v4 = vadd.f32 %v1207_v13, %v1111_v14 }
 0x1f4   :  { %v1419_v46 = vadd.f32 %v1418_v20, %v1404_v36 }
 0x1f5   :  { %v1536_v53 = vpop.eup %1535  ;;  %v1246_v56 = vmul.f32 0.5, %v1208_v4  ;;  %v855_v11 = vpop.f32.mrf.mxu2 }
 0x1f6   :  { %v1277_v25 = vmul.f32 0.5, %v1536_v53  ;;  %v973_v40 = vpop.f32.mrf.mxu3  ;;  %v856_v7 = vadd.f32 %v855_v11, %v2345_v16 }
 0x1f7   :  { %1537 = vtanh.f32 %v1246_v56  ;;  %v974_v8 = vadd.f32 %v973_v40, %v851_v22  ;;  %v1122_v47 = vpop.f32.mrf.mxu0 }
 0x1f8   :  { %v1293_v5 = vadd.f32 0.5, %v1277_v25  ;;  %v1215_v23 = vpop.f32.mrf.mxu1 }
 0x1f9   :  { %v1115_v43 = vadd.f32 %v1114_v49, %v974_v8  ;;  %v1376_v8 = vpop.permute.xlu2 %1375 }
 0x1fa   :  { %v1405_v0 = vmul.f32 %v1356_v59, %v1293_v5 }
 0x1fb   :  { %v1212_v60 = vadd.f32 %v1211_v27, %v1115_v43 }
 0x1fc   :  { %v1420_v10 = vadd.f32 %v1419_v46, %v1405_v0 }
 0x1fd   :  { %v1538_v61 = vpop.eup %1537  ;;  %v1247_v38 = vmul.f32 0.5, %v1212_v60  ;;  %v860_v28 = vpop.f32.mrf.mxu2 }
 0x1fe   :  { %v1278_v37 = vmul.f32 0.5, %v1538_v61  ;;  %v979_v29 = vpop.f32.mrf.mxu3  ;;  %v861_v57 = vadd.f32 %v860_v28, %v2354_v58 }
 0x1ff   :  { %1539 = vtanh.f32 %v1247_v38  ;;  %v980_v26 = vadd.f32 %v979_v29, %v856_v7  ;;  %v1126_v13 = vpop.f32.mrf.mxu0  ;;  %v1381_v29 = vpop.permute.xlu0 %1380 }
 0x200   :  { %v1294_v34 = vadd.f32 0.5, %v1278_v37  ;;  %v1219_v18 = vpop.f32.mrf.mxu1 }
 0x201   :  { %v1119_v44 = vadd.f32 %v1118_v32, %v980_v26 }
 0x202   :  { %v1406_v31 = vmul.f32 %v1361_v24, %v1294_v34 }
 0x203   :  { %v1216_v3 = vadd.f32 %v1215_v23, %v1119_v44 }
 0x204   :  { %v1421_v6 = vadd.f32 %v1420_v10, %v1406_v31 }
 0x205   :  { %v1540_v17 = vpop.eup %1539  ;;  %v1248_v52 = vmul.f32 0.5, %v1216_v3  ;;  %v865_v33 = vpop.f32.mrf.mxu2 }
 0x206   :  { %v1279_v16 = vmul.f32 0.5, %v1540_v17  ;;  %v985_v19 = vpop.f32.mrf.mxu3  ;;  %v866_v30 = vadd.f32 %v865_v33, %v2364_v63 }
 0x207   :  { %1541 = vtanh.f32 %v1248_v52  ;;  %v986_v48 = vadd.f32 %v985_v19, %v861_v57  ;;  %v1130_v14 = vpop.f32.mrf.mxu0 }
 0x208   :  { %v1295_v12 = vadd.f32 0.5, %v1279_v16  ;;  %v1223_v49 = vpop.f32.mrf.mxu1  ;;  %v1386_v16 = vpop.permute.xlu1 %1385 }
 0x209   :  { %v1123_v62 = vadd.f32 %v1122_v47, %v986_v48 }
 0x20a   :  { %v1407_v54 = vmul.f32 %v1366_v50, %v1295_v12 }
 0x20b   :  { %v1220_v1 = vadd.f32 %v1219_v18, %v1123_v62 }
 0x20c   :  { %v1422_v20 = vadd.f32 %v1421_v6, %v1407_v54 }
 0x20d   :  { %v1542_v35 = vpop.eup %1541  ;;  %v1249_v2 = vmul.f32 0.5, %v1220_v1  ;;  %v870_v58 = vpop.f32.mrf.mxu2 }
 0x20e   :  { %v1280_v45 = vmul.f32 0.5, %v1542_v35  ;;  %v991_v39 = vpop.f32.mrf.mxu3  ;;  %v871_v53 = vadd.f32 %v870_v58, %v2374_v42  ;;  %v1391_v1 = vpop.permute.xlu2 %1390 }
 0x20f   :  { %1543 = vtanh.f32 %v1249_v2  ;;  %v992_v55 = vadd.f32 %v991_v39, %v866_v30  ;;  %v1134_v0 = vpop.f32.mrf.mxu0 }
 0x210   :  { %v1296_v9 = vadd.f32 0.5, %v1280_v45  ;;  %v1227_v46 = vpop.f32.mrf.mxu1  ;;  %v1396_v45 = vpop.permute.xlu0 %1395 }
 0x211   :  { %v1127_v27 = vadd.f32 %v1126_v13, %v992_v55 }
 0x212   :  { %v1408_v15 = vmul.f32 %v1371_v41, %v1296_v9 }
 0x213   :  { %v1224_v36 = vadd.f32 %v1223_v49, %v1127_v27 }
 0x214   :  { %v1423_v4 = vadd.f32 %v1422_v20, %v1408_v15  ;;  %v1439_v15 = vpop.permute.xlu1 %1438 }
 0x215   :  { %v1544_v32 = vpop.eup %1543  ;;  %v1250_v22 = vmul.f32 0.5, %v1224_v36  ;;  %v875_v40 = vpop.f32.mrf.mxu2  ;;  %v1441_v36 = vperm.slane %v1439_v15, 0 }
 0x216   :  { %v1281_v56 = vmul.f32 0.5, %v1544_v32  ;;  %v997_v63 = vpop.f32.mrf.mxu3  ;;  %v876_v10 = vadd.f32 %v875_v40, %v2384_v51 }
 0x217   :  { %1545 = vtanh.f32 %v1250_v22  ;;  %v998_v11 = vadd.f32 %v997_v63, %v871_v53  ;;  %v1138_v51 = vpop.f32.mrf.mxu0 }
 0x218   :  { %v1297_v25 = vadd.f32 0.5, %v1281_v56  ;;  %v1231_v42 = vpop.f32.mrf.mxu1 }
 0x219   :  { %v1131_v5 = vadd.f32 %v1130_v14, %v998_v11 }
 0x21a   :  { %v1409_v23 = vmul.f32 %v1376_v8, %v1297_v25 }
 0x21b   :  { %v1228_v59 = vadd.f32 %v1227_v46, %v1131_v5 }
 0x21c   :  { %v1424_v43 = vadd.f32 %v1423_v4, %v1409_v23 }
 0x21d   :  { %v1546_v60 = vpop.eup %1545  ;;  %v1251_v61 = vmul.f32 0.5, %v1228_v59  ;;  %v880_v34 = vpop.f32.mrf.mxu2 }
 0x21e   :  { %v1282_v7 = vmul.f32 0.5, %v1546_v60  ;;  %v1003_v38 = vpop.f32.mrf.mxu3  ;;  %v881_v31 = vadd.f32 %v880_v34, %v2392_v21 }
 0x21f   :  { %1547 = vtanh.f32 %v1251_v61  ;;  %v1004_v28 = vadd.f32 %v1003_v38, %v876_v10 }
 0x220   :  { %v1298_v37 = vadd.f32 0.5, %v1282_v7  ;;  %v1235_v33 = vpop.f32.mrf.mxu1 }
 0x221   :  { %v1135_v47 = vadd.f32 %v1134_v0, %v1004_v28 }
 0x222   :  { %v1410_v26 = vmul.f32 %v1381_v29, %v1298_v37 }
 0x223   :  { %v1232_v18 = vadd.f32 %v1231_v42, %v1135_v47 }
 0x224   :  { %v1425_v24 = vadd.f32 %v1424_v43, %v1410_v26 }
 0x225   :  { %v1548_v44 = vpop.eup %1547  ;;  %v1252_v3 = vmul.f32 0.5, %v1232_v18 }
 0x226   :  { %v1283_v6 = vmul.f32 0.5, %v1548_v44  ;;  %v1009_v17 = vpop.f32.mrf.mxu3 }
 0x227   :  { %1549 = vtanh.f32 %v1252_v3  ;;  %v1010_v57 = vadd.f32 %v1009_v17, %v881_v31 }
 0x228   :  { %v1299_v52 = vadd.f32 0.5, %v1283_v6 }
 0x229   :  { %v1139_v19 = vadd.f32 %v1138_v51, %v1010_v57 }
 0x22a   :  { %v1411_v48 = vmul.f32 %v1386_v16, %v1299_v52 }
 0x22b   :  { %v1236_v12 = vadd.f32 %v1235_v33, %v1139_v19 }
 0x22c   :  { %v1426_v13 = vadd.f32 %v1425_v24, %v1411_v48 }
 0x22d   :  { %v1550_v50 = vpop.eup %1549  ;;  %v1253_v62 = vmul.f32 0.5, %v1236_v12 }
 0x22e   :  { %v1284_v54 = vmul.f32 0.5, %v1550_v50 }
 0x22f   :  { %1551 = vtanh.f32 %v1253_v62 }
 0x230   :  { %v1300_v49 = vadd.f32 0.5, %v1284_v54 }
 0x232   :  { %v1412_v21 = vmul.f32 %v1391_v1, %v1300_v49 }
 0x234   :  { %v1427_v20 = vadd.f32 %v1426_v13, %v1412_v21 }
 0x235   :  { %v1552_v35 = vpop.eup %1551 }
 0x236   :  { %v1285_v30 = vmul.f32 0.5, %v1552_v35 }
 0x238   :  { %v1301_v2 = vadd.f32 0.5, %v1285_v30 }
 0x23a   :  { %v1413_v58 = vmul.f32 %v1396_v45, %v1301_v2 }
 0x23c   :  { %v1428_v39 = vadd.f32 %v1427_v20, %v1413_v58 }
 0x23e   :  { %v1429_v55 = vrot.slane %v1428_v39, 4 }
 0x240   :  { %v1430_v9 = vadd.f32 %v1429_v55, %v1428_v39 }
 0x242   :  { %v1431_v41 = vrot.slane %v1430_v9, 2 }
 0x244   :  { %v1432_v27 = vadd.f32 %v1431_v41, %v1430_v9 }
 0x246   :  { %v1433_v14 = vrot.slane %v1432_v27, 1 }
 0x248   :  { %v1434_v4 = vadd.f32 %v1433_v14, %v1432_v27 }
 0x24a   :  { %v1442_v46 = vadd.f32 %v1441_v36, %v1434_v4 }
 0x24c   :  { %v1443_v32 = vmul.f32 0.5, %v1442_v46 }
 0x24e   :  { %1553 = vtanh.f32 %v1443_v32 }
 0x254   :  { %v1554_v53 = vpop.eup %1553 }
 0x255   :  { %v1445_v22 = vmul.f32 0.5, %v1554_v53 }
 0x257   :  { %v1446_v56 = vadd.f32 0.5, %v1445_v22 }
 0x259   :  { %1447 = vst [vmem:[%s2419_s7] sm:$0x1] %v1446_v56 }

</bundles_post_ra>
